<compile_context>
chip_gen: v7x
topology: tpu7x:2x2x1
jax: 0.10.0
libtpu: 0.0.40
codegen_flags: <defaults>
</compile_context>

<pallas_src>
import functools

import jax
import jax.numpy as jnp
from jax.experimental import pallas as pl
from jax.experimental.pallas import tpu as pltpu

LANES = 128
SUBLANES = 8
CHUNK = SUBLANES * LANES        # 1024 elements = one (8,128) f32 vreg
MIN_KERNEL_ROWS = 64            # below this (8K elems) plain XLA is faster


def _device_config():
    """(tensorcores_per_chip, streaming block rows, vmem limit bytes)."""
    try:
        kind = jax.devices()[0].device_kind.lower()
    except Exception:
        kind = ""
    if "v7" in kind:
        # v7x: 2 TCs/chip, 64 MiB VMEM per TC -> keep f32 tiles at 2 MiB.
        return 2, 4096, 32 * 1024 * 1024
    # v5e / v6e: 1 TC, 128 MiB VMEM -> 4 MiB f32 tiles, raise scoped VMEM.
    return 1, 8192, 64 * 1024 * 1024


def _split_main_tail(x):
    """View x as a (rows, 128) prefix (numel rounded down to 1024) + tail.

    When numel % 1024 == 0 (the common case for feature maps) this is a pure
    reshape — no pad, no copy.  Otherwise only the tiny (<1024-element) tail
    is handled outside the kernel.
    """
    n = x.size
    n_main = (n // CHUNK) * CHUNK
    flat = x.reshape(-1)
    if n_main == n:
        main2d = flat.reshape(-1, LANES)
        tail = flat[:0]
    else:
        main2d = flat[:n_main].reshape(-1, LANES)
        tail = flat[n_main:]
    return main2d, tail, n


def _sq_diff_sum(x, t):
    d = x.astype(jnp.float32) - t.astype(jnp.float32)
    return jnp.sum(d * d)


def _sum_sq_kernel(x_ref, t_ref, partial_ref, acc_ref, *,
                   rows, block_rows, steps_per_core, has_partial, has_dup):
    """Per-core sum of squared differences, accumulated in an (8,128) vreg."""
    c = pl.program_id(0)   # core / parallel slice
    i = pl.program_id(1)   # reduction step within the slice

    @pl.when(i == 0)
    def _init():
        acc_ref[...] = jnp.zeros_like(acc_ref)

    def fold(sq):
        # (block_rows, 128) -> (8, 128) accumulator: pure VPU vreg adds.
        acc_ref[...] += jnp.sum(sq.reshape(-1, SUBLANES, LANES), axis=0)

    def full_accumulate():
        d = x_ref[...].astype(jnp.float32) - t_ref[...].astype(jnp.float32)
        fold(d * d)

    if not (has_partial or has_dup):
        # Steady state: every block is fully valid -> no mask, no branches.
        full_accumulate()
    else:
        b = c * steps_per_core + i          # logical (unclamped) block index
        num_valid = rows - b * block_rows   # rows of this block inside array

        @pl.when(num_valid >= block_rows)   # fully valid block: plain path
        def _full():
            full_accumulate()

        if has_partial:
            @pl.when(jnp.logical_and(num_valid > 0, num_valid < block_rows))
            def _partial():                 # tail block: mask invalid rows
                d = (x_ref[...].astype(jnp.float32)
                     - t_ref[...].astype(jnp.float32))
                sq = d * d
                row = jax.lax.broadcasted_iota(jnp.int32, sq.shape, 0)
                fold(jnp.where(row < num_valid, sq, 0.0))
        # num_valid <= 0: clamped duplicate block -> skip accumulate entirely.

    @pl.when(i == pl.num_programs(1) - 1)
    def _finalize():
        partial_ref[0, 0] = jnp.sum(acc_ref[...])


def _sum_sq_diff_pallas(x2d, t2d, *, block_rows=None, num_cores=None):
    """Sum of squared differences over a (rows, 128) slab (rows % 8 == 0)."""
    rows = x2d.shape[0]
    dev_cores, dev_block_rows, vmem_limit = _device_config()

    forced_cores = num_cores is not None
    if block_rows is None:
        block_rows = dev_block_rows
    block_rows = min(block_rows, rows)          # rows is a multiple of 8
    num_blocks = -(-rows // block_rows)

    if num_cores is None:
        num_cores = dev_cores
    if num_blocks < num_cores:
        num_cores = 1                           # never duplicate-read a block
    steps = -(-num_blocks // num_cores)

    has_partial = (rows % block_rows) != 0
    has_dup = num_cores * steps > num_blocks

    def row_block_map(c, i):
        b = c * steps + i
        if has_dup:
            b = jnp.minimum(b, num_blocks - 1)  # clamp; kernel skips the dup
        return (b, 0)

    kernel = functools.partial(
        _sum_sq_kernel, rows=rows, block_rows=block_rows,
        steps_per_core=steps, has_partial=has_partial, has_dup=has_dup)

    if num_cores > 1 and not forced_cores and hasattr(pltpu, "CORE_PARALLEL"):
        # Real 2-TC split (v7x): each core streams its own half of the rows.
        dims = (pltpu.CORE_PARALLEL, pltpu.ARBITRARY)
    else:
        dims = ("parallel", "arbitrary")

    partials = pl.pallas_call(
        kernel,
        out_shape=jax.ShapeDtypeStruct((num_cores, 1), jnp.float32),
        grid_spec=pltpu.PrefetchScalarGridSpec(
            num_scalar_prefetch=0,
            grid=(num_cores, steps),
            in_specs=[
                pl.BlockSpec((block_rows, LANES), row_block_map),
                pl.BlockSpec((block_rows, LANES), row_block_map),
            ],
            out_specs=pl.BlockSpec((1, 1), lambda c, i: (c, 0),
                                   memory_space=pltpu.SMEM),
            scratch_shapes=[pltpu.VMEM((SUBLANES, LANES), jnp.float32)],
        ),
        compiler_params=pltpu.CompilerParams(
            dimension_semantics=dims,
            vmem_limit_bytes=vmem_limit,
        ),
    )(x2d, t2d)

    return jnp.sum(partials)


class ContentLoss:
    """JAX/Pallas port of the PyTorch ContentLoss module (forward pass)."""

    def __init__(self, target):
        # target.detach() -> stop_gradient; split/cache once (it is constant).
        t = jax.lax.stop_gradient(target)
        self._t_main, self._t_tail, self._n = _split_main_tail(t)
        self.loss = None

    def __call__(self, x):
        x_main, x_tail, n = _split_main_tail(x)
        assert n == self._n, "input/target element count mismatch"

        if x_main.shape[0] < MIN_KERNEL_ROWS:
            # Tiny tensor: launch + grid-step overhead exceeds the work.
            total = _sq_diff_sum(x_main, self._t_main)
            total = total + _sq_diff_sum(x_tail, self._t_tail)
        else:
            total = _sum_sq_diff_pallas(x_main, self._t_main)
            if x_tail.size:
                total = total + _sq_diff_sum(x_tail, self._t_tail)

        self.loss = total / jnp.float32(n)
        return x   # identity pass-through, same as the PyTorch module


if __name__ == "__main__":
    key = jax.random.PRNGKey(0)
    k1, k2, k3, k4, k5, k6 = jax.random.split(key, 6)

    # 1) Tiny tensor (2,4,16,16): exercises the XLA bypass path.
    x = jax.random.normal(k1, (2, 4, 16, 16), dtype=jnp.float32)
    t = jax.random.normal(k2, (2, 4, 16, 16), dtype=jnp.float32)
    cl = ContentLoss(t)
    out = jax.block_until_ready(cl(x))
    loss = jax.block_until_ready(cl.loss)
    ref = jnp.mean((x - t) ** 2)
    assert jnp.allclose(loss, ref, rtol=1e-5, atol=1e-6), (loss, ref)
    assert jnp.array_equal(out, x)

    # 2) Medium tensor (2,16,96,96): kernel path, single full block per core,
    #    no masking and no duplicated HBM reads.
    x2 = jax.random.normal(k3, (2, 16, 96, 96), dtype=jnp.float32)
    t2 = jax.random.normal(k4, (2, 16, 96, 96), dtype=jnp.float32)
    cl2 = ContentLoss(t2)
    out2 = jax.block_until_ready(cl2(x2))
    loss2 = jax.block_until_ready(cl2.loss)
    ref2 = jnp.mean((x2 - t2) ** 2)
    assert jnp.allclose(loss2, ref2, rtol=1e-5, atol=1e-6), (loss2, ref2)
    assert jnp.array_equal(out2, x2)

    # 3) Ragged element count (2,3,37,53): kernel on the 1024-aligned prefix,
    #    plain jnp on the <1024-element tail (no wrapper-side pad copy).
    x3 = jax.random.normal(k5, (2, 3, 37, 53), dtype=jnp.float32)
    t3 = jax.random.normal(k6, (2, 3, 37, 53), dtype=jnp.float32)
    cl3 = ContentLoss(t3)
    out3 = jax.block_until_ready(cl3(x3))
    loss3 = jax.block_until_ready(cl3.loss)
    ref3 = jnp.mean((x3 - t3) ** 2)
    assert jnp.allclose(loss3, ref3, rtol=1e-5, atol=1e-6), (loss3, ref3)
    assert jnp.array_equal(out3, x3)

    # 4) Force small blocks + a 2-slice grid (plain "parallel" semantics) to
    #    exercise the masked-tail and clamped-duplicate-skip branches.
    x2m, _, _ = _split_main_tail(x2)
    t2m, _, _ = _split_main_tail(t2)
    s = jax.block_until_ready(
        _sum_sq_diff_pallas(x2m, t2m, block_rows=512, num_cores=2))
    ref_s = jnp.sum((x2m - t2m) ** 2)
    assert jnp.allclose(s, ref_s, rtol=1e-4), (s, ref_s)

    print("KERNEL_OK")
</pallas_src>

<mosaic_0001>
module attributes {stable_mosaic.version = 11 : i64} {
  func.func @_sum_sq_kernel(%arg0: i32, %arg1: i32, %arg2: memref<2304x128xf32, #tpu.memory_space<vmem>>, %arg3: memref<2304x128xf32, #tpu.memory_space<vmem>>, %arg4: memref<1x1xf32, #tpu.memory_space<smem>>, %arg5: memref<8x128xf32, #tpu.memory_space<vmem>>) attributes {dimension_semantics = [#tpu.dimension_semantics<parallel>, #tpu.dimension_semantics<arbitrary>], iteration_bounds = array<i64: 1, 1>, scalar_prefetch = 0 : i64, scratch_operands = 1 : i64, tpu.core_type = #tpu.core_type<tc>, window_params = [{transform_indices = @transform_0, window_bounds = array<i64: 2304, 128>}, {transform_indices = @transform_1, window_bounds = array<i64: 2304, 128>}, {transform_indices = @transform_2, window_bounds = array<i64: 1, 1>}]} {
    %c0_i32 = arith.constant 0 : i32
    %0 = arith.cmpi eq, %arg1, %c0_i32 : i32
    %1 = arith.extui %0 : i1 to i32
    %c0_i32_0 = arith.constant 0 : i32
    %2 = arith.cmpi ne, %1, %c0_i32_0 : i32
    scf.if %2 {
      %cst_10 = arith.constant 0.000000e+00 : f32
      %15 = vector.broadcast %cst_10 : f32 to vector<8x128xf32>
      %c0_11 = arith.constant 0 : index
      %c0_12 = arith.constant 0 : index
      %16 = vector.load %arg5[%c0_11, %c0_12] : memref<8x128xf32, #tpu.memory_space<vmem>>, vector<8x128xf32>
      tpu.vector_store %arg5[%c0_11, %c0_12], %15 {strides = array<i32>} : memref<8x128xf32, #tpu.memory_space<vmem>>, vector<8x128xf32>,
    } else {
    }
    %c0 = arith.constant 0 : index
    %c0_1 = arith.constant 0 : index
    %3 = vector.load %arg2[%c0, %c0_1] : memref<2304x128xf32, #tpu.memory_space<vmem>>, vector<2304x128xf32>
    %c0_2 = arith.constant 0 : index
    %c0_3 = arith.constant 0 : index
    %4 = vector.load %arg3[%c0_2, %c0_3] : memref<2304x128xf32, #tpu.memory_space<vmem>>, vector<2304x128xf32>
    %5 = arith.subf %3, %4 : vector<2304x128xf32>
    %6 = arith.mulf %5, %5 : vector<2304x128xf32>
    %c0_4 = arith.constant 0 : index
    %c0_5 = arith.constant 0 : index
    %7 = vector.load %arg5[%c0_4, %c0_5] : memref<8x128xf32, #tpu.memory_space<vmem>>, vector<8x128xf32>
    %8 = vector.shape_cast %6 : vector<2304x128xf32> to vector<288x8x128xf32>
    %cst = arith.constant dense<0.000000e+00> : vector<8x128xf32>
    %9 = vector.multi_reduction <add>, %8, %cst [0] : vector<288x8x128xf32> to vector<8x128xf32>
    %10 = arith.addf %7, %9 : vector<8x128xf32>
    %c0_6 = arith.constant 0 : index
    %c0_7 = arith.constant 0 : index
    %11 = vector.load %arg5[%c0_6, %c0_7] : memref<8x128xf32, #tpu.memory_space<vmem>>, vector<8x128xf32>
    tpu.vector_store %arg5[%c0_6, %c0_7], %10 {strides = array<i32>} : memref<8x128xf32, #tpu.memory_space<vmem>>, vector<8x128xf32>,
    %c0_i32_8 = arith.constant 0 : i32
    %12 = arith.cmpi eq, %arg1, %c0_i32_8 : i32
    %13 = arith.extui %12 : i1 to i32
    %c0_i32_9 = arith.constant 0 : i32
    %14 = arith.cmpi ne, %13, %c0_i32_9 : i32
    scf.if %14 {
      %c0_10 = arith.constant 0 : index
      %c0_11 = arith.constant 0 : index
      %15 = vector.load %arg5[%c0_10, %c0_11] : memref<8x128xf32, #tpu.memory_space<vmem>>, vector<8x128xf32>
      %16 = vector.shape_cast %15 : vector<8x128xf32> to vector<1x8x128xf32>
      %cst_12 = arith.constant dense<0.000000e+00> : vector<1xf32>
      %17 = vector.multi_reduction <add>, %16, %cst_12 [1, 2] : vector<1x8x128xf32> to vector<1xf32>
      %18 = vector.shape_cast %17 : vector<1xf32> to vector<1x1x1xf32>
      %19 = vector.extract %18[0, 0, 0] : f32 from vector<1x1x1xf32>
      %c0_13 = arith.constant 0 : index
      %c0_14 = arith.constant 0 : index
      %20 = memref.load %arg4[%c0_13, %c0_14] : memref<1x1xf32, #tpu.memory_space<smem>>
      memref.store %19, %arg4[%c0_13, %c0_14] : memref<1x1xf32, #tpu.memory_space<smem>>
    } else {
    }
    return
  }
  func.func @transform_0(%arg0: i32, %arg1: i32) -> (i32, i32) {
    %c1_i32 = arith.constant 1 : i32
    %0 = arith.muli %arg0, %c1_i32 : i32
    %1 = arith.addi %0, %arg1 : i32
    %c0_i32 = arith.constant 0 : i32
    %c0_i32_0 = arith.constant 0 : i32
    return %1, %c0_i32 : i32, i32
  }
  func.func @transform_1(%arg0: i32, %arg1: i32) -> (i32, i32) {
    %c1_i32 = arith.constant 1 : i32
    %0 = arith.muli %arg0, %c1_i32 : i32
    %1 = arith.addi %0, %arg1 : i32
    %c0_i32 = arith.constant 0 : i32
    %c0_i32_0 = arith.constant 0 : i32
    return %1, %c0_i32 : i32, i32
  }
  func.func @transform_2(%arg0: i32, %arg1: i32) -> (i32, i32) {
    %c0_i32 = arith.constant 0 : i32
    %c0_i32_0 = arith.constant 0 : i32
    return %arg0, %c0_i32 : i32, i32
  }
}

</mosaic_0001>

<bundles_post_ra>
// kernel: tpu_custom_call.1
= control target key start
LH: loop header
LB: loop body
LE: loop exit
PB: predicated region body
PF: predicated region fallthrough
CT: control target
= control target key end

     0   :  { %7 = vsyncpa [#allocation4], 0  ;;  %s1652_s0 = inlined_call_operand.hbm [shape: f32[2304,128], index: 0, kind: input, shape index: {}]   ;;  %s1653_s1 = inlined_call_operand.hbm [shape: f32[2304,128], index: 1, kind: input, shape index: {}]   ;;  %s1654_s2 = inlined_call_operand.hbm [shape: f32[1,1], index: 2, kind: output, shape index: {}]  }
   0x1   :  { %8 = vsyncpa [#allocation7], 0 }
   0x2   :  { %9 = vsyncpa [#allocation5], 0  ;;  %s1596_s9 = smov [#allocation3]   ;;  %s1536_s13 = scalar_lea.hbm %s1652_s0, 36864 }
   0x3   :  { %s19_s10 = sshll.u32 %s1596_s9, 4  ;;  %p1537_p0 = scmp.ne.s32.totalorder %s1652_s0, %s1536_s13  ;;  %s20_s10 = int_to_ptr.vmem [resolvable:$true] %s19_s10 }
   0x4   :  { %p1540_p1 = scmp.lt.u32.totalorder %s1536_s13, %s1652_s0 }
   0x6   :  { %p1542_p2 = pnand %p1540_p1, %p1537_p0 }
   0x8   :  { %1545 = shalt.err (!%p1542_p2)
}
   0x9   :  { %s1546_s18 = scalar_lea.vmem %s20_s10, 36864  ;;  %p1551_p4 = scmp.lt.s32.totalorder %s20_s10, %s20_s10 }
   0xa   :  { %p1547_p3 = scmp.ne.s32.totalorder %s20_s10, %s1546_s18  ;;  %p1552_p5 = scmp.lt.s32.totalorder %s1546_s18, %s1546_s18 }
   0xc   :  { %p1553_p6 = por %p1552_p5, %p1551_p4 }
   0xe   :  { %p1554_p7 = pnand %p1553_p6, %p1547_p3 }
  0x10   :  { %1557 = shalt.err (!%p1554_p7)
}
  0x11   :  { %s1597_s19 = smov 128   ;;  %s1598_s20 = smov 8  }
  0x12   :  { %25 = dma.hbm_to_vmem [thread:$0]  %s1652_s0, 36864, %s20_s10, [#allocation4], %s1597_s19, %s1597_s19, %s1598_s20  }
  0x13   :  { %s1599_s23 = smov [#allocation6]   ;;  %s1558_s27 = scalar_lea.hbm %s1653_s1, 36864 }
  0x14   :  { %s35_s24 = sshll.u32 %s1599_s23, 4  ;;  %p1559_p8 = scmp.ne.s32.totalorder %s1653_s1, %s1558_s27  ;;  %s36_s24 = int_to_ptr.vmem [resolvable:$true] %s35_s24 }
  0x15   :  { %p1562_p9 = scmp.lt.u32.totalorder %s1558_s27, %s1653_s1 }
  0x17   :  { %p1564_p10 = pnand %p1562_p9, %p1559_p8 }
  0x19   :  { %1567 = shalt.err (!%p1564_p10)
}
  0x1a   :  { %s1568_s4 = scalar_lea.vmem %s36_s24, 36864  ;;  %p1573_p12 = scmp.lt.s32.totalorder %s36_s24, %s36_s24 }
  0x1b   :  { %p1569_p11 = scmp.ne.s32.totalorder %s36_s24, %s1568_s4  ;;  %p1574_p13 = scmp.lt.s32.totalorder %s1568_s4, %s1568_s4 }
  0x1d   :  { %p1575_p0 = por %p1574_p13, %p1573_p12 }
  0x1f   :  { %p1576_p1 = pnand %p1575_p0, %p1569_p11 }
  0x21   :  { %1579 = shalt.err (!%p1576_p1)
}
  0x22   :  { %41 = dma.hbm_to_vmem [thread:$0]  %s1653_s1, 36864, %s36_s24, [#allocation7], %s1597_s19, %s1597_s19, %s1598_s20  }
  0x23   :  { %1590 = dma.done.wait [#allocation4], 36864  }
  0x24   :  { %1591 = vsyncadd [#allocation4], 4294930432 }
  0x25   :  { %1592 = dma.done.wait [#allocation7], 36864  }
  0x26   :  { %1593 = vsyncadd [#allocation7], 4294930432  ;;  %v57_v0 = vld [vmem:[#allocation3] sm:$0xff]  ;;  %v58_v1 = vld [vmem:[#allocation3 + $0x8] sm:$0xff]  ;;  %s1580_s8 = scalar_lea.hbm %s1654_s2, 16 }
  0x27   :  { %v345_v2 = vld [vmem:[#allocation6] sm:$0xff]  ;;  %v346_v3 = vld [vmem:[#allocation6 + $0x8] sm:$0xff]  ;;  %v59_v4 = vld [vmem:[#allocation3 + $0x10] sm:$0xff]  ;;  %p1581_p2 = scmp.ne.s32.totalorder %s1654_s2, %s1580_s8  ;;  %p1584_p3 = scmp.lt.u32.totalorder %s1580_s8, %s1654_s2 }
  0x28   :  { %v347_v5 = vld [vmem:[#allocation6 + $0x10] sm:$0xff]  ;;  %v633_v6 = vsub.f32 %v57_v0, %v345_v2  ;;  %v634_v7 = vsub.f32 %v58_v1, %v346_v3  ;;  %v60_v8 = vld [vmem:[#allocation3 + $0x18] sm:$0xff]  ;;  %v61_v11 = vld [vmem:[#allocation3 + $0x20] sm:$0xff] }
  0x29   :  { %v348_v9 = vld [vmem:[#allocation6 + $0x18] sm:$0xff]  ;;  %v635_v10 = vsub.f32 %v59_v4, %v347_v5  ;;  %v349_v12 = vld [vmem:[#allocation6 + $0x20] sm:$0xff]  ;;  %v62_v16 = vld [vmem:[#allocation3 + $0x28] sm:$0xff]  ;;  %p1586_p4 = pnand %p1584_p3, %p1581_p2 }
  0x2a   :  { %v636_v13 = vsub.f32 %v60_v8, %v348_v9  ;;  %v921_v14 = vmul.f32 %v633_v6, %v633_v6  ;;  %v922_v15 = vmul.f32 %v634_v7, %v634_v7  ;;  %v350_v17 = vld [vmem:[#allocation6 + $0x28] sm:$0xff]  ;;  %v637_v18 = vsub.f32 %v61_v11, %v349_v12  ;;  %v63_v20 = vld [vmem:[#allocation3 + $0x30] sm:$0xff]  ;;  %v64_v25 = vld [vmem:[#allocation3 + $0x38] sm:$0xff] }
  0x2b   :  { %v923_v19 = vmul.f32 %v635_v10, %v635_v10  ;;  %v351_v21 = vld [vmem:[#allocation6 + $0x30] sm:$0xff]  ;;  %v638_v22 = vsub.f32 %v62_v16, %v350_v17  ;;  %v352_v26 = vld [vmem:[#allocation6 + $0x38] sm:$0xff]  ;;  %v65_v30 = vld [vmem:[#allocation3 + $0x40] sm:$0xff] }
  0x2c   :  { %v924_v23 = vmul.f32 %v636_v13, %v636_v13  ;;  %v1210_v24 = vadd.f32 %v922_v15, %v921_v14  ;;  %v639_v27 = vsub.f32 %v63_v20, %v351_v21  ;;  %v925_v28 = vmul.f32 %v637_v18, %v637_v18  ;;  %v353_v31 = vld [vmem:[#allocation6 + $0x40] sm:$0xff]  ;;  %v66_v35 = vld [vmem:[#allocation3 + $0x48] sm:$0xff]  ;;  %v67_v40 = vld [vmem:[#allocation3 + $0x50] sm:$0xff] }
  0x2d   :  { %v640_v32 = vsub.f32 %v64_v25, %v352_v26  ;;  %v926_v33 = vmul.f32 %v638_v22, %v638_v22  ;;  %v354_v36 = vld [vmem:[#allocation6 + $0x48] sm:$0xff]  ;;  %v641_v37 = vsub.f32 %v65_v30, %v353_v31  ;;  %v355_v41 = vld [vmem:[#allocation6 + $0x50] sm:$0xff]  ;;  %v68_v45 = vld [vmem:[#allocation3 + $0x58] sm:$0xff] }
  0x2e   :  { %v1211_v29 = vadd.f32 %v1210_v24, %v923_v19  ;;  %v927_v38 = vmul.f32 %v639_v27, %v639_v27  ;;  %v642_v42 = vsub.f32 %v66_v35, %v354_v36  ;;  %v356_v46 = vld [vmem:[#allocation6 + $0x58] sm:$0xff]  ;;  %v643_v47 = vsub.f32 %v67_v40, %v355_v41  ;;  %v69_v50 = vld [vmem:[#allocation3 + $0x60] sm:$0xff]  ;;  %v70_v55 = vld [vmem:[#allocation3 + $0x68] sm:$0xff] }
  0x2f   :  { %v928_v43 = vmul.f32 %v640_v32, %v640_v32  ;;  %v929_v48 = vmul.f32 %v641_v37, %v641_v37  ;;  %v357_v51 = vld [vmem:[#allocation6 + $0x60] sm:$0xff]  ;;  %v644_v52 = vsub.f32 %v68_v45, %v356_v46  ;;  %v358_v56 = vld [vmem:[#allocation6 + $0x68] sm:$0xff]  ;;  %v71_v60 = vld [vmem:[#allocation3 + $0x70] sm:$0xff] }
  0x30   :  { %v1212_v34 = vadd.f32 %v1211_v29, %v924_v23  ;;  %v930_v53 = vmul.f32 %v642_v42, %v642_v42  ;;  %v645_v57 = vsub.f32 %v69_v50, %v357_v51  ;;  %v931_v58 = vmul.f32 %v643_v47, %v643_v47  ;;  %v359_v61 = vld [vmem:[#allocation6 + $0x70] sm:$0xff]  ;;  %v72_v1 = vld [vmem:[#allocation3 + $0x78] sm:$0xff]  ;;  %v73_v6 = vld [vmem:[#allocation3 + $0x80] sm:$0xff] }
  0x31   :  { %v646_v62 = vsub.f32 %v70_v55, %v358_v56  ;;  %v932_v63 = vmul.f32 %v644_v52, %v644_v52  ;;  %v360_v2 = vld [vmem:[#allocation6 + $0x78] sm:$0xff]  ;;  %v647_v3 = vsub.f32 %v71_v60, %v359_v61  ;;  %v361_v7 = vld [vmem:[#allocation6 + $0x80] sm:$0xff]  ;;  %v74_v11 = vld [vmem:[#allocation3 + $0x88] sm:$0xff] }
  0x32   :  { %v1213_v39 = vadd.f32 %v1212_v34, %v925_v28  ;;  %v933_v4 = vmul.f32 %v645_v57, %v645_v57  ;;  %v648_v8 = vsub.f32 %v72_v1, %v360_v2  ;;  %v362_v12 = vld [vmem:[#allocation6 + $0x88] sm:$0xff]  ;;  %v649_v13 = vsub.f32 %v73_v6, %v361_v7  ;;  %v75_v16 = vld [vmem:[#allocation3 + $0x90] sm:$0xff]  ;;  %v76_v21 = vld [vmem:[#allocation3 + $0x98] sm:$0xff] }
  0x33   :  { %v934_v9 = vmul.f32 %v646_v62, %v646_v62  ;;  %v935_v14 = vmul.f32 %v647_v3, %v647_v3  ;;  %v363_v17 = vld [vmem:[#allocation6 + $0x90] sm:$0xff]  ;;  %v650_v18 = vsub.f32 %v74_v11, %v362_v12  ;;  %v364_v22 = vld [vmem:[#allocation6 + $0x98] sm:$0xff]  ;;  %v77_v26 = vld [vmem:[#allocation3 + $0xa0] sm:$0xff] }
  0x34   :  { %v1214_v44 = vadd.f32 %v1213_v39, %v926_v33  ;;  %v936_v19 = vmul.f32 %v648_v8, %v648_v8  ;;  %v651_v23 = vsub.f32 %v75_v16, %v363_v17  ;;  %v937_v24 = vmul.f32 %v649_v13, %v649_v13  ;;  %v365_v27 = vld [vmem:[#allocation6 + $0xa0] sm:$0xff]  ;;  %v78_v31 = vld [vmem:[#allocation3 + $0xa8] sm:$0xff]  ;;  %v79_v36 = vld [vmem:[#allocation3 + $0xb0] sm:$0xff] }
  0x35   :  { %v652_v28 = vsub.f32 %v76_v21, %v364_v22  ;;  %v938_v29 = vmul.f32 %v650_v18, %v650_v18  ;;  %v366_v32 = vld [vmem:[#allocation6 + $0xa8] sm:$0xff]  ;;  %v653_v33 = vsub.f32 %v77_v26, %v365_v27  ;;  %v367_v37 = vld [vmem:[#allocation6 + $0xb0] sm:$0xff]  ;;  %v80_v41 = vld [vmem:[#allocation3 + $0xb8] sm:$0xff] }
  0x36   :  { %v1215_v49 = vadd.f32 %v1214_v44, %v927_v38  ;;  %v939_v34 = vmul.f32 %v651_v23, %v651_v23  ;;  %v654_v38 = vsub.f32 %v78_v31, %v366_v32  ;;  %v368_v42 = vld [vmem:[#allocation6 + $0xb8] sm:$0xff]  ;;  %v81_v46 = vld [vmem:[#allocation3 + $0xc0] sm:$0xff]  ;;  %v82_v51 = vld [vmem:[#allocation3 + $0xc8] sm:$0xff] }
  0x37   :  { %v940_v39 = vmul.f32 %v652_v28, %v652_v28  ;;  %v941_v44 = vmul.f32 %v653_v33, %v653_v33  ;;  %v369_v47 = vld [vmem:[#allocation6 + $0xc0] sm:$0xff]  ;;  %v370_v52 = vld [vmem:[#allocation6 + $0xc8] sm:$0xff]  ;;  %v83_v56 = vld [vmem:[#allocation3 + $0xd0] sm:$0xff] }
  0x38   :  { %v1216_v54 = vadd.f32 %v1215_v49, %v928_v43  ;;  %v655_v43 = vsub.f32 %v79_v36, %v367_v37  ;;  %v942_v49 = vmul.f32 %v654_v38, %v654_v38  ;;  %v371_v57 = vld [vmem:[#allocation6 + $0xd0] sm:$0xff]  ;;  %v84_v61 = vld [vmem:[#allocation3 + $0xd8] sm:$0xff]  ;;  %v85_v2 = vld [vmem:[#allocation3 + $0xe0] sm:$0xff] }
  0x39   :  { %v372_v62 = vld [vmem:[#allocation6 + $0xd8] sm:$0xff]  ;;  %v373_v3 = vld [vmem:[#allocation6 + $0xe0] sm:$0xff]  ;;  %v86_v7 = vld [vmem:[#allocation3 + $0xe8] sm:$0xff] }
  0x3a   :  { %v1217_v59 = vadd.f32 %v1216_v54, %v929_v48  ;;  %v656_v48 = vsub.f32 %v80_v41, %v368_v42  ;;  %v943_v54 = vmul.f32 %v655_v43, %v655_v43  ;;  %v374_v8 = vld [vmem:[#allocation6 + $0xe8] sm:$0xff]  ;;  %v87_v12 = vld [vmem:[#allocation3 + $0xf0] sm:$0xff]  ;;  %v88_v17 = vld [vmem:[#allocation3 + $0xf8] sm:$0xff] }
  0x3b   :  { %v375_v13 = vld [vmem:[#allocation6 + $0xf0] sm:$0xff]  ;;  %v376_v18 = vld [vmem:[#allocation6 + $0xf8] sm:$0xff]  ;;  %v89_v22 = vld [vmem:[#allocation3 + $0x100] sm:$0xff] }
  0x3c   :  { %v1218_v0 = vadd.f32 %v1217_v59, %v930_v53  ;;  %v657_v53 = vsub.f32 %v81_v46, %v369_v47  ;;  %v944_v59 = vmul.f32 %v656_v48, %v656_v48  ;;  %v377_v23 = vld [vmem:[#allocation6 + $0x100] sm:$0xff]  ;;  %v90_v27 = vld [vmem:[#allocation3 + $0x108] sm:$0xff]  ;;  %v91_v32 = vld [vmem:[#allocation3 + $0x110] sm:$0xff] }
  0x3d   :  { %v378_v28 = vld [vmem:[#allocation6 + $0x108] sm:$0xff]  ;;  %v379_v33 = vld [vmem:[#allocation6 + $0x110] sm:$0xff]  ;;  %v92_v37 = vld [vmem:[#allocation3 + $0x118] sm:$0xff] }
  0x3e   :  { %v1219_v5 = vadd.f32 %v1218_v0, %v931_v58  ;;  %v658_v58 = vsub.f32 %v82_v51, %v370_v52  ;;  %v945_v0 = vmul.f32 %v657_v53, %v657_v53  ;;  %v380_v38 = vld [vmem:[#allocation6 + $0x118] sm:$0xff]  ;;  %v93_v42 = vld [vmem:[#allocation3 + $0x120] sm:$0xff]  ;;  %v94_v47 = vld [vmem:[#allocation3 + $0x128] sm:$0xff] }
  0x3f   :  { %v381_v43 = vld [vmem:[#allocation6 + $0x120] sm:$0xff]  ;;  %v382_v48 = vld [vmem:[#allocation6 + $0x128] sm:$0xff]  ;;  %v95_v52 = vld [vmem:[#allocation3 + $0x130] sm:$0xff] }
  0x40   :  { %v1220_v10 = vadd.f32 %v1219_v5, %v932_v63  ;;  %v659_v63 = vsub.f32 %v83_v56, %v371_v57  ;;  %v946_v5 = vmul.f32 %v658_v58, %v658_v58  ;;  %v383_v53 = vld [vmem:[#allocation6 + $0x130] sm:$0xff]  ;;  %v96_v57 = vld [vmem:[#allocation3 + $0x138] sm:$0xff] }
  0x41   :  { %v384_v58 = vld [vmem:[#allocation6 + $0x138] sm:$0xff] }
  0x42   :  { %v1221_v15 = vadd.f32 %v1220_v10, %v933_v4  ;;  %v660_v4 = vsub.f32 %v84_v61, %v372_v62  ;;  %v947_v10 = vmul.f32 %v659_v63, %v659_v63  ;;  %v97_v62 = vld [vmem:[#allocation3 + $0x140] sm:$0xff] }
  0x43   :  { %v385_v63 = vld [vmem:[#allocation6 + $0x140] sm:$0xff] }
  0x44   :  { %v1222_v20 = vadd.f32 %v1221_v15, %v934_v9  ;;  %v661_v9 = vsub.f32 %v85_v2, %v373_v3  ;;  %v948_v15 = vmul.f32 %v660_v4, %v660_v4  ;;  %v98_v3 = vld [vmem:[#allocation3 + $0x148] sm:$0xff] }
  0x45   :  { %v386_v4 = vld [vmem:[#allocation6 + $0x148] sm:$0xff] }
  0x46   :  { %v1223_v25 = vadd.f32 %v1222_v20, %v935_v14  ;;  %v662_v14 = vsub.f32 %v86_v7, %v374_v8  ;;  %v949_v20 = vmul.f32 %v661_v9, %v661_v9  ;;  %v99_v8 = vld [vmem:[#allocation3 + $0x150] sm:$0xff] }
  0x47   :  { %v387_v9 = vld [vmem:[#allocation6 + $0x150] sm:$0xff] }
  0x48   :  { %v1224_v30 = vadd.f32 %v1223_v25, %v936_v19  ;;  %v663_v19 = vsub.f32 %v87_v12, %v375_v13  ;;  %v950_v25 = vmul.f32 %v662_v14, %v662_v14  ;;  %v100_v13 = vld [vmem:[#allocation3 + $0x158] sm:$0xff] }
  0x49   :  { %v388_v14 = vld [vmem:[#allocation6 + $0x158] sm:$0xff] }
  0x4a   :  { %v1225_v35 = vadd.f32 %v1224_v30, %v937_v24  ;;  %v664_v24 = vsub.f32 %v88_v17, %v376_v18  ;;  %v951_v30 = vmul.f32 %v663_v19, %v663_v19  ;;  %v101_v18 = vld [vmem:[#allocation3 + $0x160] sm:$0xff] }
  0x4b   :  { %v389_v19 = vld [vmem:[#allocation6 + $0x160] sm:$0xff] }
  0x4c   :  { %v1226_v40 = vadd.f32 %v1225_v35, %v938_v29  ;;  %v665_v29 = vsub.f32 %v89_v22, %v377_v23  ;;  %v952_v35 = vmul.f32 %v664_v24, %v664_v24  ;;  %v102_v23 = vld [vmem:[#allocation3 + $0x168] sm:$0xff] }
  0x4d   :  { %v390_v24 = vld [vmem:[#allocation6 + $0x168] sm:$0xff] }
  0x4e   :  { %v1227_v45 = vadd.f32 %v1226_v40, %v939_v34  ;;  %v666_v34 = vsub.f32 %v90_v27, %v378_v28  ;;  %v953_v40 = vmul.f32 %v665_v29, %v665_v29  ;;  %v103_v28 = vld [vmem:[#allocation3 + $0x170] sm:$0xff] }
  0x4f   :  { %v391_v29 = vld [vmem:[#allocation6 + $0x170] sm:$0xff] }
  0x50   :  { %v1228_v50 = vadd.f32 %v1227_v45, %v940_v39  ;;  %v667_v39 = vsub.f32 %v91_v32, %v379_v33  ;;  %v954_v45 = vmul.f32 %v666_v34, %v666_v34  ;;  %v104_v33 = vld [vmem:[#allocation3 + $0x178] sm:$0xff] }
  0x51   :  { %v392_v34 = vld [vmem:[#allocation6 + $0x178] sm:$0xff] }
  0x52   :  { %v1229_v55 = vadd.f32 %v1228_v50, %v941_v44  ;;  %v668_v44 = vsub.f32 %v92_v37, %v380_v38  ;;  %v955_v50 = vmul.f32 %v667_v39, %v667_v39  ;;  %v105_v38 = vld [vmem:[#allocation3 + $0x180] sm:$0xff] }
  0x53   :  { %v393_v39 = vld [vmem:[#allocation6 + $0x180] sm:$0xff] }
  0x54   :  { %v1230_v60 = vadd.f32 %v1229_v55, %v942_v49  ;;  %v669_v49 = vsub.f32 %v93_v42, %v381_v43  ;;  %v956_v55 = vmul.f32 %v668_v44, %v668_v44  ;;  %v106_v43 = vld [vmem:[#allocation3 + $0x188] sm:$0xff] }
  0x55   :  { %v394_v44 = vld [vmem:[#allocation6 + $0x188] sm:$0xff] }
  0x56   :  { %v1231_v1 = vadd.f32 %v1230_v60, %v943_v54  ;;  %v670_v54 = vsub.f32 %v94_v47, %v382_v48  ;;  %v957_v60 = vmul.f32 %v669_v49, %v669_v49  ;;  %v107_v48 = vld [vmem:[#allocation3 + $0x190] sm:$0xff] }
  0x57   :  { %v395_v49 = vld [vmem:[#allocation6 + $0x190] sm:$0xff] }
  0x58   :  { %v1232_v6 = vadd.f32 %v1231_v1, %v944_v59  ;;  %v671_v59 = vsub.f32 %v95_v52, %v383_v53  ;;  %v958_v1 = vmul.f32 %v670_v54, %v670_v54  ;;  %v108_v53 = vld [vmem:[#allocation3 + $0x198] sm:$0xff] }
  0x59   :  { %v396_v54 = vld [vmem:[#allocation6 + $0x198] sm:$0xff] }
  0x5a   :  { %v1233_v11 = vadd.f32 %v1232_v6, %v945_v0  ;;  %v672_v0 = vsub.f32 %v96_v57, %v384_v58  ;;  %v959_v6 = vmul.f32 %v671_v59, %v671_v59  ;;  %v109_v58 = vld [vmem:[#allocation3 + $0x1a0] sm:$0xff] }
  0x5b   :  { %v397_v59 = vld [vmem:[#allocation6 + $0x1a0] sm:$0xff] }
  0x5c   :  { %v1234_v16 = vadd.f32 %v1233_v11, %v946_v5  ;;  %v673_v5 = vsub.f32 %v97_v62, %v385_v63  ;;  %v960_v11 = vmul.f32 %v672_v0, %v672_v0  ;;  %v110_v63 = vld [vmem:[#allocation3 + $0x1a8] sm:$0xff] }
  0x5d   :  { %v398_v0 = vld [vmem:[#allocation6 + $0x1a8] sm:$0xff] }
  0x5e   :  { %v1235_v21 = vadd.f32 %v1234_v16, %v947_v10  ;;  %v674_v10 = vsub.f32 %v98_v3, %v386_v4  ;;  %v961_v16 = vmul.f32 %v673_v5, %v673_v5  ;;  %v111_v4 = vld [vmem:[#allocation3 + $0x1b0] sm:$0xff] }
  0x5f   :  { %v399_v5 = vld [vmem:[#allocation6 + $0x1b0] sm:$0xff] }
  0x60   :  { %v1236_v26 = vadd.f32 %v1235_v21, %v948_v15  ;;  %v675_v15 = vsub.f32 %v99_v8, %v387_v9  ;;  %v962_v21 = vmul.f32 %v674_v10, %v674_v10  ;;  %v112_v9 = vld [vmem:[#allocation3 + $0x1b8] sm:$0xff] }
  0x61   :  { %v400_v10 = vld [vmem:[#allocation6 + $0x1b8] sm:$0xff] }
  0x62   :  { %v1237_v31 = vadd.f32 %v1236_v26, %v949_v20  ;;  %v676_v20 = vsub.f32 %v100_v13, %v388_v14  ;;  %v963_v26 = vmul.f32 %v675_v15, %v675_v15  ;;  %v113_v14 = vld [vmem:[#allocation3 + $0x1c0] sm:$0xff] }
  0x63   :  { %v401_v15 = vld [vmem:[#allocation6 + $0x1c0] sm:$0xff] }
  0x64   :  { %v1238_v36 = vadd.f32 %v1237_v31, %v950_v25  ;;  %v677_v25 = vsub.f32 %v101_v18, %v389_v19  ;;  %v964_v31 = vmul.f32 %v676_v20, %v676_v20  ;;  %v114_v19 = vld [vmem:[#allocation3 + $0x1c8] sm:$0xff] }
  0x65   :  { %v402_v20 = vld [vmem:[#allocation6 + $0x1c8] sm:$0xff] }
  0x66   :  { %v1239_v41 = vadd.f32 %v1238_v36, %v951_v30  ;;  %v678_v30 = vsub.f32 %v102_v23, %v390_v24  ;;  %v965_v36 = vmul.f32 %v677_v25, %v677_v25  ;;  %v115_v24 = vld [vmem:[#allocation3 + $0x1d0] sm:$0xff] }
  0x67   :  { %v403_v25 = vld [vmem:[#allocation6 + $0x1d0] sm:$0xff] }
  0x68   :  { %v1240_v46 = vadd.f32 %v1239_v41, %v952_v35  ;;  %v679_v35 = vsub.f32 %v103_v28, %v391_v29  ;;  %v966_v41 = vmul.f32 %v678_v30, %v678_v30  ;;  %v116_v29 = vld [vmem:[#allocation3 + $0x1d8] sm:$0xff] }
  0x69   :  { %v404_v30 = vld [vmem:[#allocation6 + $0x1d8] sm:$0xff] }
  0x6a   :  { %v1241_v51 = vadd.f32 %v1240_v46, %v953_v40  ;;  %v680_v40 = vsub.f32 %v104_v33, %v392_v34  ;;  %v967_v46 = vmul.f32 %v679_v35, %v679_v35  ;;  %v117_v34 = vld [vmem:[#allocation3 + $0x1e0] sm:$0xff] }
  0x6b   :  { %v405_v35 = vld [vmem:[#allocation6 + $0x1e0] sm:$0xff] }
  0x6c   :  { %v1242_v56 = vadd.f32 %v1241_v51, %v954_v45  ;;  %v681_v45 = vsub.f32 %v105_v38, %v393_v39  ;;  %v968_v51 = vmul.f32 %v680_v40, %v680_v40  ;;  %v118_v39 = vld [vmem:[#allocation3 + $0x1e8] sm:$0xff] }
  0x6d   :  { %v406_v40 = vld [vmem:[#allocation6 + $0x1e8] sm:$0xff] }
  0x6e   :  { %v1243_v61 = vadd.f32 %v1242_v56, %v955_v50  ;;  %v682_v50 = vsub.f32 %v106_v43, %v394_v44  ;;  %v969_v56 = vmul.f32 %v681_v45, %v681_v45  ;;  %v119_v44 = vld [vmem:[#allocation3 + $0x1f0] sm:$0xff] }
  0x6f   :  { %v407_v45 = vld [vmem:[#allocation6 + $0x1f0] sm:$0xff] }
  0x70   :  { %v1244_v2 = vadd.f32 %v1243_v61, %v956_v55  ;;  %v683_v55 = vsub.f32 %v107_v48, %v395_v49  ;;  %v970_v61 = vmul.f32 %v682_v50, %v682_v50  ;;  %v120_v49 = vld [vmem:[#allocation3 + $0x1f8] sm:$0xff] }
  0x71   :  { %v408_v50 = vld [vmem:[#allocation6 + $0x1f8] sm:$0xff] }
  0x72   :  { %v1245_v7 = vadd.f32 %v1244_v2, %v957_v60  ;;  %v684_v60 = vsub.f32 %v108_v53, %v396_v54  ;;  %v971_v2 = vmul.f32 %v683_v55, %v683_v55  ;;  %v121_v54 = vld [vmem:[#allocation3 + $0x200] sm:$0xff] }
  0x73   :  { %v409_v55 = vld [vmem:[#allocation6 + $0x200] sm:$0xff] }
  0x74   :  { %v1246_v12 = vadd.f32 %v1245_v7, %v958_v1  ;;  %v685_v1 = vsub.f32 %v109_v58, %v397_v59  ;;  %v972_v7 = vmul.f32 %v684_v60, %v684_v60  ;;  %v122_v59 = vld [vmem:[#allocation3 + $0x208] sm:$0xff] }
  0x75   :  { %v410_v60 = vld [vmem:[#allocation6 + $0x208] sm:$0xff] }
  0x76   :  { %v1247_v17 = vadd.f32 %v1246_v12, %v959_v6  ;;  %v686_v6 = vsub.f32 %v110_v63, %v398_v0  ;;  %v973_v12 = vmul.f32 %v685_v1, %v685_v1  ;;  %v123_v0 = vld [vmem:[#allocation3 + $0x210] sm:$0xff] }
  0x77   :  { %v411_v1 = vld [vmem:[#allocation6 + $0x210] sm:$0xff] }
  0x78   :  { %v1248_v22 = vadd.f32 %v1247_v17, %v960_v11  ;;  %v687_v11 = vsub.f32 %v111_v4, %v399_v5  ;;  %v974_v17 = vmul.f32 %v686_v6, %v686_v6  ;;  %v124_v5 = vld [vmem:[#allocation3 + $0x218] sm:$0xff] }
  0x79   :  { %v412_v6 = vld [vmem:[#allocation6 + $0x218] sm:$0xff] }
  0x7a   :  { %v1249_v27 = vadd.f32 %v1248_v22, %v961_v16  ;;  %v688_v16 = vsub.f32 %v112_v9, %v400_v10  ;;  %v975_v22 = vmul.f32 %v687_v11, %v687_v11  ;;  %v125_v10 = vld [vmem:[#allocation3 + $0x220] sm:$0xff] }
  0x7b   :  { %v413_v11 = vld [vmem:[#allocation6 + $0x220] sm:$0xff] }
  0x7c   :  { %v1250_v32 = vadd.f32 %v1249_v27, %v962_v21  ;;  %v689_v21 = vsub.f32 %v113_v14, %v401_v15  ;;  %v976_v27 = vmul.f32 %v688_v16, %v688_v16  ;;  %v126_v15 = vld [vmem:[#allocation3 + $0x228] sm:$0xff] }
  0x7d   :  { %v414_v16 = vld [vmem:[#allocation6 + $0x228] sm:$0xff] }
  0x7e   :  { %v1251_v37 = vadd.f32 %v1250_v32, %v963_v26  ;;  %v690_v26 = vsub.f32 %v114_v19, %v402_v20  ;;  %v977_v32 = vmul.f32 %v689_v21, %v689_v21  ;;  %v127_v20 = vld [vmem:[#allocation3 + $0x230] sm:$0xff] }
  0x7f   :  { %v415_v21 = vld [vmem:[#allocation6 + $0x230] sm:$0xff] }
  0x80   :  { %v1252_v42 = vadd.f32 %v1251_v37, %v964_v31  ;;  %v691_v31 = vsub.f32 %v115_v24, %v403_v25  ;;  %v978_v37 = vmul.f32 %v690_v26, %v690_v26  ;;  %v128_v25 = vld [vmem:[#allocation3 + $0x238] sm:$0xff] }
  0x81   :  { %v416_v26 = vld [vmem:[#allocation6 + $0x238] sm:$0xff] }
  0x82   :  { %v1253_v47 = vadd.f32 %v1252_v42, %v965_v36  ;;  %v692_v36 = vsub.f32 %v116_v29, %v404_v30  ;;  %v979_v42 = vmul.f32 %v691_v31, %v691_v31  ;;  %v129_v30 = vld [vmem:[#allocation3 + $0x240] sm:$0xff] }
  0x83   :  { %v417_v31 = vld [vmem:[#allocation6 + $0x240] sm:$0xff] }
  0x84   :  { %v1254_v52 = vadd.f32 %v1253_v47, %v966_v41  ;;  %v693_v41 = vsub.f32 %v117_v34, %v405_v35  ;;  %v980_v47 = vmul.f32 %v692_v36, %v692_v36  ;;  %v130_v35 = vld [vmem:[#allocation3 + $0x248] sm:$0xff] }
  0x85   :  { %v418_v36 = vld [vmem:[#allocation6 + $0x248] sm:$0xff] }
  0x86   :  { %v1255_v57 = vadd.f32 %v1254_v52, %v967_v46  ;;  %v694_v46 = vsub.f32 %v118_v39, %v406_v40  ;;  %v981_v52 = vmul.f32 %v693_v41, %v693_v41  ;;  %v131_v40 = vld [vmem:[#allocation3 + $0x250] sm:$0xff] }
  0x87   :  { %v419_v41 = vld [vmem:[#allocation6 + $0x250] sm:$0xff] }
  0x88   :  { %v1256_v62 = vadd.f32 %v1255_v57, %v968_v51  ;;  %v695_v51 = vsub.f32 %v119_v44, %v407_v45  ;;  %v982_v57 = vmul.f32 %v694_v46, %v694_v46  ;;  %v132_v45 = vld [vmem:[#allocation3 + $0x258] sm:$0xff] }
  0x89   :  { %v420_v46 = vld [vmem:[#allocation6 + $0x258] sm:$0xff] }
  0x8a   :  { %v1257_v3 = vadd.f32 %v1256_v62, %v969_v56  ;;  %v696_v56 = vsub.f32 %v120_v49, %v408_v50  ;;  %v983_v62 = vmul.f32 %v695_v51, %v695_v51  ;;  %v133_v50 = vld [vmem:[#allocation3 + $0x260] sm:$0xff] }
  0x8b   :  { %v421_v51 = vld [vmem:[#allocation6 + $0x260] sm:$0xff] }
  0x8c   :  { %v1258_v8 = vadd.f32 %v1257_v3, %v970_v61  ;;  %v697_v61 = vsub.f32 %v121_v54, %v409_v55  ;;  %v984_v3 = vmul.f32 %v696_v56, %v696_v56  ;;  %v134_v55 = vld [vmem:[#allocation3 + $0x268] sm:$0xff] }
  0x8d   :  { %v422_v56 = vld [vmem:[#allocation6 + $0x268] sm:$0xff] }
  0x8e   :  { %v1259_v13 = vadd.f32 %v1258_v8, %v971_v2  ;;  %v698_v2 = vsub.f32 %v122_v59, %v410_v60  ;;  %v985_v8 = vmul.f32 %v697_v61, %v697_v61  ;;  %v135_v60 = vld [vmem:[#allocation3 + $0x270] sm:$0xff] }
  0x8f   :  { %v423_v61 = vld [vmem:[#allocation6 + $0x270] sm:$0xff] }
  0x90   :  { %v1260_v18 = vadd.f32 %v1259_v13, %v972_v7  ;;  %v699_v7 = vsub.f32 %v123_v0, %v411_v1  ;;  %v986_v13 = vmul.f32 %v698_v2, %v698_v2  ;;  %v136_v1 = vld [vmem:[#allocation3 + $0x278] sm:$0xff] }
  0x91   :  { %v424_v2 = vld [vmem:[#allocation6 + $0x278] sm:$0xff] }
  0x92   :  { %v1261_v23 = vadd.f32 %v1260_v18, %v973_v12  ;;  %v700_v12 = vsub.f32 %v124_v5, %v412_v6  ;;  %v987_v18 = vmul.f32 %v699_v7, %v699_v7  ;;  %v137_v6 = vld [vmem:[#allocation3 + $0x280] sm:$0xff] }
  0x93   :  { %v425_v7 = vld [vmem:[#allocation6 + $0x280] sm:$0xff] }
  0x94   :  { %v1262_v28 = vadd.f32 %v1261_v23, %v974_v17  ;;  %v701_v17 = vsub.f32 %v125_v10, %v413_v11  ;;  %v988_v23 = vmul.f32 %v700_v12, %v700_v12  ;;  %v138_v11 = vld [vmem:[#allocation3 + $0x288] sm:$0xff] }
  0x95   :  { %v426_v12 = vld [vmem:[#allocation6 + $0x288] sm:$0xff] }
  0x96   :  { %v1263_v33 = vadd.f32 %v1262_v28, %v975_v22  ;;  %v702_v22 = vsub.f32 %v126_v15, %v414_v16  ;;  %v989_v28 = vmul.f32 %v701_v17, %v701_v17  ;;  %v139_v16 = vld [vmem:[#allocation3 + $0x290] sm:$0xff] }
  0x97   :  { %v427_v17 = vld [vmem:[#allocation6 + $0x290] sm:$0xff] }
  0x98   :  { %v1264_v38 = vadd.f32 %v1263_v33, %v976_v27  ;;  %v703_v27 = vsub.f32 %v127_v20, %v415_v21  ;;  %v990_v33 = vmul.f32 %v702_v22, %v702_v22  ;;  %v140_v21 = vld [vmem:[#allocation3 + $0x298] sm:$0xff] }
  0x99   :  { %v428_v22 = vld [vmem:[#allocation6 + $0x298] sm:$0xff] }
  0x9a   :  { %v1265_v43 = vadd.f32 %v1264_v38, %v977_v32  ;;  %v704_v32 = vsub.f32 %v128_v25, %v416_v26  ;;  %v991_v38 = vmul.f32 %v703_v27, %v703_v27  ;;  %v141_v26 = vld [vmem:[#allocation3 + $0x2a0] sm:$0xff] }
  0x9b   :  { %v429_v27 = vld [vmem:[#allocation6 + $0x2a0] sm:$0xff] }
  0x9c   :  { %v1266_v48 = vadd.f32 %v1265_v43, %v978_v37  ;;  %v705_v37 = vsub.f32 %v129_v30, %v417_v31  ;;  %v992_v43 = vmul.f32 %v704_v32, %v704_v32  ;;  %v142_v31 = vld [vmem:[#allocation3 + $0x2a8] sm:$0xff] }
  0x9d   :  { %v430_v32 = vld [vmem:[#allocation6 + $0x2a8] sm:$0xff] }
  0x9e   :  { %v1267_v53 = vadd.f32 %v1266_v48, %v979_v42  ;;  %v706_v42 = vsub.f32 %v130_v35, %v418_v36  ;;  %v993_v48 = vmul.f32 %v705_v37, %v705_v37  ;;  %v143_v36 = vld [vmem:[#allocation3 + $0x2b0] sm:$0xff] }
  0x9f   :  { %v431_v37 = vld [vmem:[#allocation6 + $0x2b0] sm:$0xff] }
  0xa0   :  { %v1268_v58 = vadd.f32 %v1267_v53, %v980_v47  ;;  %v707_v47 = vsub.f32 %v131_v40, %v419_v41  ;;  %v994_v53 = vmul.f32 %v706_v42, %v706_v42  ;;  %v144_v41 = vld [vmem:[#allocation3 + $0x2b8] sm:$0xff] }
  0xa1   :  { %v432_v42 = vld [vmem:[#allocation6 + $0x2b8] sm:$0xff] }
  0xa2   :  { %v1269_v63 = vadd.f32 %v1268_v58, %v981_v52  ;;  %v708_v52 = vsub.f32 %v132_v45, %v420_v46  ;;  %v995_v58 = vmul.f32 %v707_v47, %v707_v47  ;;  %v145_v46 = vld [vmem:[#allocation3 + $0x2c0] sm:$0xff] }
  0xa3   :  { %v433_v47 = vld [vmem:[#allocation6 + $0x2c0] sm:$0xff] }
  0xa4   :  { %v1270_v4 = vadd.f32 %v1269_v63, %v982_v57  ;;  %v709_v57 = vsub.f32 %v133_v50, %v421_v51  ;;  %v996_v63 = vmul.f32 %v708_v52, %v708_v52  ;;  %v146_v51 = vld [vmem:[#allocation3 + $0x2c8] sm:$0xff] }
  0xa5   :  { %v434_v52 = vld [vmem:[#allocation6 + $0x2c8] sm:$0xff] }
  0xa6   :  { %v1271_v9 = vadd.f32 %v1270_v4, %v983_v62  ;;  %v710_v62 = vsub.f32 %v134_v55, %v422_v56  ;;  %v997_v4 = vmul.f32 %v709_v57, %v709_v57  ;;  %v147_v56 = vld [vmem:[#allocation3 + $0x2d0] sm:$0xff] }
  0xa7   :  { %v435_v57 = vld [vmem:[#allocation6 + $0x2d0] sm:$0xff] }
  0xa8   :  { %v1272_v14 = vadd.f32 %v1271_v9, %v984_v3  ;;  %v711_v3 = vsub.f32 %v135_v60, %v423_v61  ;;  %v998_v9 = vmul.f32 %v710_v62, %v710_v62  ;;  %v148_v61 = vld [vmem:[#allocation3 + $0x2d8] sm:$0xff] }
  0xa9   :  { %v436_v62 = vld [vmem:[#allocation6 + $0x2d8] sm:$0xff] }
  0xaa   :  { %v1273_v19 = vadd.f32 %v1272_v14, %v985_v8  ;;  %v712_v8 = vsub.f32 %v136_v1, %v424_v2  ;;  %v999_v14 = vmul.f32 %v711_v3, %v711_v3  ;;  %v149_v2 = vld [vmem:[#allocation3 + $0x2e0] sm:$0xff] }
  0xab   :  { %v437_v3 = vld [vmem:[#allocation6 + $0x2e0] sm:$0xff] }
  0xac   :  { %v1274_v24 = vadd.f32 %v1273_v19, %v986_v13  ;;  %v713_v13 = vsub.f32 %v137_v6, %v425_v7  ;;  %v1000_v19 = vmul.f32 %v712_v8, %v712_v8  ;;  %v150_v7 = vld [vmem:[#allocation3 + $0x2e8] sm:$0xff] }
  0xad   :  { %v438_v8 = vld [vmem:[#allocation6 + $0x2e8] sm:$0xff] }
  0xae   :  { %v1275_v29 = vadd.f32 %v1274_v24, %v987_v18  ;;  %v714_v18 = vsub.f32 %v138_v11, %v426_v12  ;;  %v1001_v24 = vmul.f32 %v713_v13, %v713_v13  ;;  %v151_v12 = vld [vmem:[#allocation3 + $0x2f0] sm:$0xff] }
  0xaf   :  { %v439_v13 = vld [vmem:[#allocation6 + $0x2f0] sm:$0xff] }
  0xb0   :  { %v1276_v34 = vadd.f32 %v1275_v29, %v988_v23  ;;  %v715_v23 = vsub.f32 %v139_v16, %v427_v17  ;;  %v1002_v29 = vmul.f32 %v714_v18, %v714_v18  ;;  %v152_v17 = vld [vmem:[#allocation3 + $0x2f8] sm:$0xff] }
  0xb1   :  { %v440_v18 = vld [vmem:[#allocation6 + $0x2f8] sm:$0xff] }
  0xb2   :  { %v1277_v39 = vadd.f32 %v1276_v34, %v989_v28  ;;  %v716_v28 = vsub.f32 %v140_v21, %v428_v22  ;;  %v1003_v34 = vmul.f32 %v715_v23, %v715_v23  ;;  %v153_v22 = vld [vmem:[#allocation3 + $0x300] sm:$0xff] }
  0xb3   :  { %v441_v23 = vld [vmem:[#allocation6 + $0x300] sm:$0xff] }
  0xb4   :  { %v1278_v44 = vadd.f32 %v1277_v39, %v990_v33  ;;  %v717_v33 = vsub.f32 %v141_v26, %v429_v27  ;;  %v1004_v39 = vmul.f32 %v716_v28, %v716_v28  ;;  %v154_v27 = vld [vmem:[#allocation3 + $0x308] sm:$0xff] }
  0xb5   :  { %v442_v28 = vld [vmem:[#allocation6 + $0x308] sm:$0xff] }
  0xb6   :  { %v1279_v49 = vadd.f32 %v1278_v44, %v991_v38  ;;  %v718_v38 = vsub.f32 %v142_v31, %v430_v32  ;;  %v1005_v44 = vmul.f32 %v717_v33, %v717_v33  ;;  %v155_v32 = vld [vmem:[#allocation3 + $0x310] sm:$0xff] }
  0xb7   :  { %v443_v33 = vld [vmem:[#allocation6 + $0x310] sm:$0xff] }
  0xb8   :  { %v1280_v54 = vadd.f32 %v1279_v49, %v992_v43  ;;  %v719_v43 = vsub.f32 %v143_v36, %v431_v37  ;;  %v1006_v49 = vmul.f32 %v718_v38, %v718_v38  ;;  %v156_v37 = vld [vmem:[#allocation3 + $0x318] sm:$0xff] }
  0xb9   :  { %v444_v38 = vld [vmem:[#allocation6 + $0x318] sm:$0xff] }
  0xba   :  { %v1281_v59 = vadd.f32 %v1280_v54, %v993_v48  ;;  %v720_v48 = vsub.f32 %v144_v41, %v432_v42  ;;  %v1007_v54 = vmul.f32 %v719_v43, %v719_v43  ;;  %v157_v42 = vld [vmem:[#allocation3 + $0x320] sm:$0xff] }
  0xbb   :  { %v445_v43 = vld [vmem:[#allocation6 + $0x320] sm:$0xff] }
  0xbc   :  { %v1282_v0 = vadd.f32 %v1281_v59, %v994_v53  ;;  %v721_v53 = vsub.f32 %v145_v46, %v433_v47  ;;  %v1008_v59 = vmul.f32 %v720_v48, %v720_v48  ;;  %v158_v47 = vld [vmem:[#allocation3 + $0x328] sm:$0xff] }
  0xbd   :  { %v446_v48 = vld [vmem:[#allocation6 + $0x328] sm:$0xff] }
  0xbe   :  { %v1283_v5 = vadd.f32 %v1282_v0, %v995_v58  ;;  %v722_v58 = vsub.f32 %v146_v51, %v434_v52  ;;  %v1009_v0 = vmul.f32 %v721_v53, %v721_v53  ;;  %v159_v52 = vld [vmem:[#allocation3 + $0x330] sm:$0xff] }
  0xbf   :  { %v447_v53 = vld [vmem:[#allocation6 + $0x330] sm:$0xff] }
  0xc0   :  { %v1284_v10 = vadd.f32 %v1283_v5, %v996_v63  ;;  %v723_v63 = vsub.f32 %v147_v56, %v435_v57  ;;  %v1010_v5 = vmul.f32 %v722_v58, %v722_v58  ;;  %v160_v57 = vld [vmem:[#allocation3 + $0x338] sm:$0xff] }
  0xc1   :  { %v448_v58 = vld [vmem:[#allocation6 + $0x338] sm:$0xff] }
  0xc2   :  { %v1285_v15 = vadd.f32 %v1284_v10, %v997_v4  ;;  %v724_v4 = vsub.f32 %v148_v61, %v436_v62  ;;  %v1011_v10 = vmul.f32 %v723_v63, %v723_v63  ;;  %v161_v62 = vld [vmem:[#allocation3 + $0x340] sm:$0xff] }
  0xc3   :  { %v449_v63 = vld [vmem:[#allocation6 + $0x340] sm:$0xff] }
  0xc4   :  { %v1286_v20 = vadd.f32 %v1285_v15, %v998_v9  ;;  %v725_v9 = vsub.f32 %v149_v2, %v437_v3  ;;  %v1012_v15 = vmul.f32 %v724_v4, %v724_v4  ;;  %v162_v3 = vld [vmem:[#allocation3 + $0x348] sm:$0xff] }
  0xc5   :  { %v450_v4 = vld [vmem:[#allocation6 + $0x348] sm:$0xff] }
  0xc6   :  { %v1287_v25 = vadd.f32 %v1286_v20, %v999_v14  ;;  %v726_v14 = vsub.f32 %v150_v7, %v438_v8  ;;  %v1013_v20 = vmul.f32 %v725_v9, %v725_v9  ;;  %v163_v8 = vld [vmem:[#allocation3 + $0x350] sm:$0xff] }
  0xc7   :  { %v451_v9 = vld [vmem:[#allocation6 + $0x350] sm:$0xff] }
  0xc8   :  { %v1288_v30 = vadd.f32 %v1287_v25, %v1000_v19  ;;  %v727_v19 = vsub.f32 %v151_v12, %v439_v13  ;;  %v1014_v25 = vmul.f32 %v726_v14, %v726_v14  ;;  %v164_v13 = vld [vmem:[#allocation3 + $0x358] sm:$0xff] }
  0xc9   :  { %v452_v14 = vld [vmem:[#allocation6 + $0x358] sm:$0xff] }
  0xca   :  { %v1289_v35 = vadd.f32 %v1288_v30, %v1001_v24  ;;  %v728_v24 = vsub.f32 %v152_v17, %v440_v18  ;;  %v1015_v30 = vmul.f32 %v727_v19, %v727_v19  ;;  %v165_v18 = vld [vmem:[#allocation3 + $0x360] sm:$0xff] }
  0xcb   :  { %v453_v19 = vld [vmem:[#allocation6 + $0x360] sm:$0xff] }
  0xcc   :  { %v1290_v40 = vadd.f32 %v1289_v35, %v1002_v29  ;;  %v729_v29 = vsub.f32 %v153_v22, %v441_v23  ;;  %v1016_v35 = vmul.f32 %v728_v24, %v728_v24  ;;  %v166_v23 = vld [vmem:[#allocation3 + $0x368] sm:$0xff] }
  0xcd   :  { %v454_v24 = vld [vmem:[#allocation6 + $0x368] sm:$0xff] }
  0xce   :  { %v1291_v45 = vadd.f32 %v1290_v40, %v1003_v34  ;;  %v730_v34 = vsub.f32 %v154_v27, %v442_v28  ;;  %v1017_v40 = vmul.f32 %v729_v29, %v729_v29  ;;  %v167_v28 = vld [vmem:[#allocation3 + $0x370] sm:$0xff] }
  0xcf   :  { %v455_v29 = vld [vmem:[#allocation6 + $0x370] sm:$0xff] }
  0xd0   :  { %v1292_v50 = vadd.f32 %v1291_v45, %v1004_v39  ;;  %v731_v39 = vsub.f32 %v155_v32, %v443_v33  ;;  %v1018_v45 = vmul.f32 %v730_v34, %v730_v34  ;;  %v168_v33 = vld [vmem:[#allocation3 + $0x378] sm:$0xff] }
  0xd1   :  { %v456_v34 = vld [vmem:[#allocation6 + $0x378] sm:$0xff] }
  0xd2   :  { %v1293_v55 = vadd.f32 %v1292_v50, %v1005_v44  ;;  %v732_v44 = vsub.f32 %v156_v37, %v444_v38  ;;  %v1019_v50 = vmul.f32 %v731_v39, %v731_v39  ;;  %v169_v38 = vld [vmem:[#allocation3 + $0x380] sm:$0xff] }
  0xd3   :  { %v457_v39 = vld [vmem:[#allocation6 + $0x380] sm:$0xff] }
  0xd4   :  { %v1294_v60 = vadd.f32 %v1293_v55, %v1006_v49  ;;  %v733_v49 = vsub.f32 %v157_v42, %v445_v43  ;;  %v1020_v55 = vmul.f32 %v732_v44, %v732_v44  ;;  %v170_v43 = vld [vmem:[#allocation3 + $0x388] sm:$0xff] }
  0xd5   :  { %v458_v44 = vld [vmem:[#allocation6 + $0x388] sm:$0xff] }
  0xd6   :  { %v1295_v1 = vadd.f32 %v1294_v60, %v1007_v54  ;;  %v734_v54 = vsub.f32 %v158_v47, %v446_v48  ;;  %v1021_v60 = vmul.f32 %v733_v49, %v733_v49  ;;  %v171_v48 = vld [vmem:[#allocation3 + $0x390] sm:$0xff] }
  0xd7   :  { %v459_v49 = vld [vmem:[#allocation6 + $0x390] sm:$0xff] }
  0xd8   :  { %v1296_v6 = vadd.f32 %v1295_v1, %v1008_v59  ;;  %v735_v59 = vsub.f32 %v159_v52, %v447_v53  ;;  %v1022_v1 = vmul.f32 %v734_v54, %v734_v54  ;;  %v172_v53 = vld [vmem:[#allocation3 + $0x398] sm:$0xff] }
  0xd9   :  { %v460_v54 = vld [vmem:[#allocation6 + $0x398] sm:$0xff] }
  0xda   :  { %v1297_v11 = vadd.f32 %v1296_v6, %v1009_v0  ;;  %v736_v0 = vsub.f32 %v160_v57, %v448_v58  ;;  %v1023_v6 = vmul.f32 %v735_v59, %v735_v59  ;;  %v173_v58 = vld [vmem:[#allocation3 + $0x3a0] sm:$0xff] }
  0xdb   :  { %v461_v59 = vld [vmem:[#allocation6 + $0x3a0] sm:$0xff] }
  0xdc   :  { %v1298_v16 = vadd.f32 %v1297_v11, %v1010_v5  ;;  %v737_v5 = vsub.f32 %v161_v62, %v449_v63  ;;  %v1024_v11 = vmul.f32 %v736_v0, %v736_v0  ;;  %v174_v63 = vld [vmem:[#allocation3 + $0x3a8] sm:$0xff] }
  0xdd   :  { %v462_v0 = vld [vmem:[#allocation6 + $0x3a8] sm:$0xff] }
  0xde   :  { %v1299_v21 = vadd.f32 %v1298_v16, %v1011_v10  ;;  %v738_v10 = vsub.f32 %v162_v3, %v450_v4  ;;  %v1025_v16 = vmul.f32 %v737_v5, %v737_v5  ;;  %v175_v4 = vld [vmem:[#allocation3 + $0x3b0] sm:$0xff] }
  0xdf   :  { %v463_v5 = vld [vmem:[#allocation6 + $0x3b0] sm:$0xff] }
  0xe0   :  { %v1300_v26 = vadd.f32 %v1299_v21, %v1012_v15  ;;  %v739_v15 = vsub.f32 %v163_v8, %v451_v9  ;;  %v1026_v21 = vmul.f32 %v738_v10, %v738_v10  ;;  %v176_v9 = vld [vmem:[#allocation3 + $0x3b8] sm:$0xff] }
  0xe1   :  { %v464_v10 = vld [vmem:[#allocation6 + $0x3b8] sm:$0xff] }
  0xe2   :  { %v1301_v31 = vadd.f32 %v1300_v26, %v1013_v20  ;;  %v740_v20 = vsub.f32 %v164_v13, %v452_v14  ;;  %v1027_v26 = vmul.f32 %v739_v15, %v739_v15  ;;  %v177_v14 = vld [vmem:[#allocation3 + $0x3c0] sm:$0xff] }
  0xe3   :  { %v465_v15 = vld [vmem:[#allocation6 + $0x3c0] sm:$0xff] }
  0xe4   :  { %v1302_v36 = vadd.f32 %v1301_v31, %v1014_v25  ;;  %v741_v25 = vsub.f32 %v165_v18, %v453_v19  ;;  %v1028_v31 = vmul.f32 %v740_v20, %v740_v20  ;;  %v178_v19 = vld [vmem:[#allocation3 + $0x3c8] sm:$0xff] }
  0xe5   :  { %v466_v20 = vld [vmem:[#allocation6 + $0x3c8] sm:$0xff] }
  0xe6   :  { %v1303_v41 = vadd.f32 %v1302_v36, %v1015_v30  ;;  %v742_v30 = vsub.f32 %v166_v23, %v454_v24  ;;  %v1029_v36 = vmul.f32 %v741_v25, %v741_v25  ;;  %v179_v24 = vld [vmem:[#allocation3 + $0x3d0] sm:$0xff] }
  0xe7   :  { %v467_v25 = vld [vmem:[#allocation6 + $0x3d0] sm:$0xff] }
  0xe8   :  { %v1304_v46 = vadd.f32 %v1303_v41, %v1016_v35  ;;  %v743_v35 = vsub.f32 %v167_v28, %v455_v29  ;;  %v1030_v41 = vmul.f32 %v742_v30, %v742_v30  ;;  %v180_v29 = vld [vmem:[#allocation3 + $0x3d8] sm:$0xff] }
  0xe9   :  { %v468_v30 = vld [vmem:[#allocation6 + $0x3d8] sm:$0xff] }
  0xea   :  { %v1305_v51 = vadd.f32 %v1304_v46, %v1017_v40  ;;  %v744_v40 = vsub.f32 %v168_v33, %v456_v34  ;;  %v1031_v46 = vmul.f32 %v743_v35, %v743_v35  ;;  %v181_v34 = vld [vmem:[#allocation3 + $0x3e0] sm:$0xff] }
  0xeb   :  { %v469_v35 = vld [vmem:[#allocation6 + $0x3e0] sm:$0xff] }
  0xec   :  { %v1306_v56 = vadd.f32 %v1305_v51, %v1018_v45  ;;  %v745_v45 = vsub.f32 %v169_v38, %v457_v39  ;;  %v1032_v51 = vmul.f32 %v744_v40, %v744_v40  ;;  %v182_v39 = vld [vmem:[#allocation3 + $0x3e8] sm:$0xff] }
  0xed   :  { %v470_v40 = vld [vmem:[#allocation6 + $0x3e8] sm:$0xff] }
  0xee   :  { %v1307_v61 = vadd.f32 %v1306_v56, %v1019_v50  ;;  %v746_v50 = vsub.f32 %v170_v43, %v458_v44  ;;  %v1033_v56 = vmul.f32 %v745_v45, %v745_v45  ;;  %v183_v44 = vld [vmem:[#allocation3 + $0x3f0] sm:$0xff] }
  0xef   :  { %v471_v45 = vld [vmem:[#allocation6 + $0x3f0] sm:$0xff] }
  0xf0   :  { %v1308_v2 = vadd.f32 %v1307_v61, %v1020_v55  ;;  %v747_v55 = vsub.f32 %v171_v48, %v459_v49  ;;  %v1034_v61 = vmul.f32 %v746_v50, %v746_v50  ;;  %v184_v49 = vld [vmem:[#allocation3 + $0x3f8] sm:$0xff] }
  0xf1   :  { %v472_v50 = vld [vmem:[#allocation6 + $0x3f8] sm:$0xff] }
  0xf2   :  { %v1309_v7 = vadd.f32 %v1308_v2, %v1021_v60  ;;  %v748_v60 = vsub.f32 %v172_v53, %v460_v54  ;;  %v1035_v2 = vmul.f32 %v747_v55, %v747_v55  ;;  %v185_v54 = vld [vmem:[#allocation3 + $0x400] sm:$0xff] }
  0xf3   :  { %v473_v55 = vld [vmem:[#allocation6 + $0x400] sm:$0xff] }
  0xf4   :  { %v1310_v12 = vadd.f32 %v1309_v7, %v1022_v1  ;;  %v749_v1 = vsub.f32 %v173_v58, %v461_v59  ;;  %v1036_v7 = vmul.f32 %v748_v60, %v748_v60  ;;  %v186_v59 = vld [vmem:[#allocation3 + $0x408] sm:$0xff] }
  0xf5   :  { %v474_v60 = vld [vmem:[#allocation6 + $0x408] sm:$0xff] }
  0xf6   :  { %v1311_v17 = vadd.f32 %v1310_v12, %v1023_v6  ;;  %v750_v6 = vsub.f32 %v174_v63, %v462_v0  ;;  %v1037_v12 = vmul.f32 %v749_v1, %v749_v1  ;;  %v187_v0 = vld [vmem:[#allocation3 + $0x410] sm:$0xff] }
  0xf7   :  { %v475_v1 = vld [vmem:[#allocation6 + $0x410] sm:$0xff] }
  0xf8   :  { %v1312_v22 = vadd.f32 %v1311_v17, %v1024_v11  ;;  %v751_v11 = vsub.f32 %v175_v4, %v463_v5  ;;  %v1038_v17 = vmul.f32 %v750_v6, %v750_v6  ;;  %v188_v5 = vld [vmem:[#allocation3 + $0x418] sm:$0xff] }
  0xf9   :  { %v476_v6 = vld [vmem:[#allocation6 + $0x418] sm:$0xff] }
  0xfa   :  { %v1313_v27 = vadd.f32 %v1312_v22, %v1025_v16  ;;  %v752_v16 = vsub.f32 %v176_v9, %v464_v10  ;;  %v1039_v22 = vmul.f32 %v751_v11, %v751_v11  ;;  %v189_v10 = vld [vmem:[#allocation3 + $0x420] sm:$0xff] }
  0xfb   :  { %v477_v11 = vld [vmem:[#allocation6 + $0x420] sm:$0xff] }
  0xfc   :  { %v1314_v32 = vadd.f32 %v1313_v27, %v1026_v21  ;;  %v753_v21 = vsub.f32 %v177_v14, %v465_v15  ;;  %v1040_v27 = vmul.f32 %v752_v16, %v752_v16  ;;  %v190_v15 = vld [vmem:[#allocation3 + $0x428] sm:$0xff] }
  0xfd   :  { %v478_v16 = vld [vmem:[#allocation6 + $0x428] sm:$0xff] }
  0xfe   :  { %v1315_v37 = vadd.f32 %v1314_v32, %v1027_v26  ;;  %v754_v26 = vsub.f32 %v178_v19, %v466_v20  ;;  %v1041_v32 = vmul.f32 %v753_v21, %v753_v21  ;;  %v191_v20 = vld [vmem:[#allocation3 + $0x430] sm:$0xff] }
  0xff   :  { %v479_v21 = vld [vmem:[#allocation6 + $0x430] sm:$0xff] }
 0x100   :  { %v1316_v42 = vadd.f32 %v1315_v37, %v1028_v31  ;;  %v755_v31 = vsub.f32 %v179_v24, %v467_v25  ;;  %v1042_v37 = vmul.f32 %v754_v26, %v754_v26  ;;  %v192_v25 = vld [vmem:[#allocation3 + $0x438] sm:$0xff] }
 0x101   :  { %v480_v26 = vld [vmem:[#allocation6 + $0x438] sm:$0xff] }
 0x102   :  { %v1317_v47 = vadd.f32 %v1316_v42, %v1029_v36  ;;  %v756_v36 = vsub.f32 %v180_v29, %v468_v30  ;;  %v1043_v42 = vmul.f32 %v755_v31, %v755_v31  ;;  %v193_v30 = vld [vmem:[#allocation3 + $0x440] sm:$0xff] }
 0x103   :  { %v481_v31 = vld [vmem:[#allocation6 + $0x440] sm:$0xff] }
 0x104   :  { %v1318_v52 = vadd.f32 %v1317_v47, %v1030_v41  ;;  %v757_v41 = vsub.f32 %v181_v34, %v469_v35  ;;  %v1044_v47 = vmul.f32 %v756_v36, %v756_v36  ;;  %v194_v35 = vld [vmem:[#allocation3 + $0x448] sm:$0xff] }
 0x105   :  { %v482_v36 = vld [vmem:[#allocation6 + $0x448] sm:$0xff] }
 0x106   :  { %v1319_v57 = vadd.f32 %v1318_v52, %v1031_v46  ;;  %v758_v46 = vsub.f32 %v182_v39, %v470_v40  ;;  %v1045_v52 = vmul.f32 %v757_v41, %v757_v41  ;;  %v195_v40 = vld [vmem:[#allocation3 + $0x450] sm:$0xff] }
 0x107   :  { %v483_v41 = vld [vmem:[#allocation6 + $0x450] sm:$0xff] }
 0x108   :  { %v1320_v62 = vadd.f32 %v1319_v57, %v1032_v51  ;;  %v759_v51 = vsub.f32 %v183_v44, %v471_v45  ;;  %v1046_v57 = vmul.f32 %v758_v46, %v758_v46  ;;  %v196_v45 = vld [vmem:[#allocation3 + $0x458] sm:$0xff] }
 0x109   :  { %v484_v46 = vld [vmem:[#allocation6 + $0x458] sm:$0xff] }
 0x10a   :  { %v1321_v3 = vadd.f32 %v1320_v62, %v1033_v56  ;;  %v760_v56 = vsub.f32 %v184_v49, %v472_v50  ;;  %v1047_v62 = vmul.f32 %v759_v51, %v759_v51  ;;  %v197_v50 = vld [vmem:[#allocation3 + $0x460] sm:$0xff] }
 0x10b   :  { %v485_v51 = vld [vmem:[#allocation6 + $0x460] sm:$0xff] }
 0x10c   :  { %v1322_v8 = vadd.f32 %v1321_v3, %v1034_v61  ;;  %v761_v61 = vsub.f32 %v185_v54, %v473_v55  ;;  %v1048_v3 = vmul.f32 %v760_v56, %v760_v56  ;;  %v198_v55 = vld [vmem:[#allocation3 + $0x468] sm:$0xff] }
 0x10d   :  { %v486_v56 = vld [vmem:[#allocation6 + $0x468] sm:$0xff] }
 0x10e   :  { %v1323_v13 = vadd.f32 %v1322_v8, %v1035_v2  ;;  %v762_v2 = vsub.f32 %v186_v59, %v474_v60  ;;  %v1049_v8 = vmul.f32 %v761_v61, %v761_v61  ;;  %v199_v60 = vld [vmem:[#allocation3 + $0x470] sm:$0xff] }
 0x10f   :  { %v487_v61 = vld [vmem:[#allocation6 + $0x470] sm:$0xff] }
 0x110   :  { %v1324_v18 = vadd.f32 %v1323_v13, %v1036_v7  ;;  %v763_v7 = vsub.f32 %v187_v0, %v475_v1  ;;  %v1050_v13 = vmul.f32 %v762_v2, %v762_v2  ;;  %v200_v1 = vld [vmem:[#allocation3 + $0x478] sm:$0xff] }
 0x111   :  { %v488_v2 = vld [vmem:[#allocation6 + $0x478] sm:$0xff] }
 0x112   :  { %v1325_v23 = vadd.f32 %v1324_v18, %v1037_v12  ;;  %v764_v12 = vsub.f32 %v188_v5, %v476_v6  ;;  %v1051_v18 = vmul.f32 %v763_v7, %v763_v7  ;;  %v201_v6 = vld [vmem:[#allocation3 + $0x480] sm:$0xff] }
 0x113   :  { %v489_v7 = vld [vmem:[#allocation6 + $0x480] sm:$0xff] }
 0x114   :  { %v1326_v28 = vadd.f32 %v1325_v23, %v1038_v17  ;;  %v765_v17 = vsub.f32 %v189_v10, %v477_v11  ;;  %v1052_v23 = vmul.f32 %v764_v12, %v764_v12  ;;  %v202_v11 = vld [vmem:[#allocation3 + $0x488] sm:$0xff] }
 0x115   :  { %v490_v12 = vld [vmem:[#allocation6 + $0x488] sm:$0xff] }
 0x116   :  { %v1327_v33 = vadd.f32 %v1326_v28, %v1039_v22  ;;  %v766_v22 = vsub.f32 %v190_v15, %v478_v16  ;;  %v1053_v28 = vmul.f32 %v765_v17, %v765_v17  ;;  %v203_v16 = vld [vmem:[#allocation3 + $0x490] sm:$0xff] }
 0x117   :  { %v491_v17 = vld [vmem:[#allocation6 + $0x490] sm:$0xff] }
 0x118   :  { %v1328_v38 = vadd.f32 %v1327_v33, %v1040_v27  ;;  %v767_v27 = vsub.f32 %v191_v20, %v479_v21  ;;  %v1054_v33 = vmul.f32 %v766_v22, %v766_v22  ;;  %v204_v21 = vld [vmem:[#allocation3 + $0x498] sm:$0xff] }
 0x119   :  { %v492_v22 = vld [vmem:[#allocation6 + $0x498] sm:$0xff] }
 0x11a   :  { %v1329_v43 = vadd.f32 %v1328_v38, %v1041_v32  ;;  %v768_v32 = vsub.f32 %v192_v25, %v480_v26  ;;  %v1055_v38 = vmul.f32 %v767_v27, %v767_v27  ;;  %v205_v26 = vld [vmem:[#allocation3 + $0x4a0] sm:$0xff] }
 0x11b   :  { %v493_v27 = vld [vmem:[#allocation6 + $0x4a0] sm:$0xff] }
 0x11c   :  { %v1330_v48 = vadd.f32 %v1329_v43, %v1042_v37  ;;  %v769_v37 = vsub.f32 %v193_v30, %v481_v31  ;;  %v1056_v43 = vmul.f32 %v768_v32, %v768_v32  ;;  %v206_v31 = vld [vmem:[#allocation3 + $0x4a8] sm:$0xff] }
 0x11d   :  { %v494_v32 = vld [vmem:[#allocation6 + $0x4a8] sm:$0xff] }
 0x11e   :  { %v1331_v53 = vadd.f32 %v1330_v48, %v1043_v42  ;;  %v770_v42 = vsub.f32 %v194_v35, %v482_v36  ;;  %v1057_v48 = vmul.f32 %v769_v37, %v769_v37  ;;  %v207_v36 = vld [vmem:[#allocation3 + $0x4b0] sm:$0xff] }
 0x11f   :  { %v495_v37 = vld [vmem:[#allocation6 + $0x4b0] sm:$0xff] }
 0x120   :  { %v1332_v58 = vadd.f32 %v1331_v53, %v1044_v47  ;;  %v771_v47 = vsub.f32 %v195_v40, %v483_v41  ;;  %v1058_v53 = vmul.f32 %v770_v42, %v770_v42  ;;  %v208_v41 = vld [vmem:[#allocation3 + $0x4b8] sm:$0xff] }
 0x121   :  { %v496_v42 = vld [vmem:[#allocation6 + $0x4b8] sm:$0xff] }
 0x122   :  { %v1333_v63 = vadd.f32 %v1332_v58, %v1045_v52  ;;  %v772_v52 = vsub.f32 %v196_v45, %v484_v46  ;;  %v1059_v58 = vmul.f32 %v771_v47, %v771_v47  ;;  %v209_v46 = vld [vmem:[#allocation3 + $0x4c0] sm:$0xff] }
 0x123   :  { %v497_v47 = vld [vmem:[#allocation6 + $0x4c0] sm:$0xff] }
 0x124   :  { %v1334_v4 = vadd.f32 %v1333_v63, %v1046_v57  ;;  %v773_v57 = vsub.f32 %v197_v50, %v485_v51  ;;  %v1060_v63 = vmul.f32 %v772_v52, %v772_v52  ;;  %v210_v51 = vld [vmem:[#allocation3 + $0x4c8] sm:$0xff] }
 0x125   :  { %v498_v52 = vld [vmem:[#allocation6 + $0x4c8] sm:$0xff] }
 0x126   :  { %v1335_v9 = vadd.f32 %v1334_v4, %v1047_v62  ;;  %v774_v62 = vsub.f32 %v198_v55, %v486_v56  ;;  %v1061_v4 = vmul.f32 %v773_v57, %v773_v57  ;;  %v211_v56 = vld [vmem:[#allocation3 + $0x4d0] sm:$0xff] }
 0x127   :  { %v499_v57 = vld [vmem:[#allocation6 + $0x4d0] sm:$0xff] }
 0x128   :  { %v1336_v14 = vadd.f32 %v1335_v9, %v1048_v3  ;;  %v775_v3 = vsub.f32 %v199_v60, %v487_v61  ;;  %v1062_v9 = vmul.f32 %v774_v62, %v774_v62  ;;  %v212_v61 = vld [vmem:[#allocation3 + $0x4d8] sm:$0xff] }
 0x129   :  { %v500_v62 = vld [vmem:[#allocation6 + $0x4d8] sm:$0xff] }
 0x12a   :  { %v1337_v19 = vadd.f32 %v1336_v14, %v1049_v8  ;;  %v776_v8 = vsub.f32 %v200_v1, %v488_v2  ;;  %v1063_v14 = vmul.f32 %v775_v3, %v775_v3  ;;  %v213_v2 = vld [vmem:[#allocation3 + $0x4e0] sm:$0xff] }
 0x12b   :  { %v501_v3 = vld [vmem:[#allocation6 + $0x4e0] sm:$0xff] }
 0x12c   :  { %v1338_v24 = vadd.f32 %v1337_v19, %v1050_v13  ;;  %v777_v13 = vsub.f32 %v201_v6, %v489_v7  ;;  %v1064_v19 = vmul.f32 %v776_v8, %v776_v8  ;;  %v214_v7 = vld [vmem:[#allocation3 + $0x4e8] sm:$0xff] }
 0x12d   :  { %v502_v8 = vld [vmem:[#allocation6 + $0x4e8] sm:$0xff] }
 0x12e   :  { %v1339_v29 = vadd.f32 %v1338_v24, %v1051_v18  ;;  %v778_v18 = vsub.f32 %v202_v11, %v490_v12  ;;  %v1065_v24 = vmul.f32 %v777_v13, %v777_v13  ;;  %v215_v12 = vld [vmem:[#allocation3 + $0x4f0] sm:$0xff] }
 0x12f   :  { %v503_v13 = vld [vmem:[#allocation6 + $0x4f0] sm:$0xff] }
 0x130   :  { %v1340_v34 = vadd.f32 %v1339_v29, %v1052_v23  ;;  %v779_v23 = vsub.f32 %v203_v16, %v491_v17  ;;  %v1066_v29 = vmul.f32 %v778_v18, %v778_v18  ;;  %v216_v17 = vld [vmem:[#allocation3 + $0x4f8] sm:$0xff] }
 0x131   :  { %v504_v18 = vld [vmem:[#allocation6 + $0x4f8] sm:$0xff] }
 0x132   :  { %v1341_v39 = vadd.f32 %v1340_v34, %v1053_v28  ;;  %v780_v28 = vsub.f32 %v204_v21, %v492_v22  ;;  %v1067_v34 = vmul.f32 %v779_v23, %v779_v23  ;;  %v217_v22 = vld [vmem:[#allocation3 + $0x500] sm:$0xff] }
 0x133   :  { %v505_v23 = vld [vmem:[#allocation6 + $0x500] sm:$0xff] }
 0x134   :  { %v1342_v44 = vadd.f32 %v1341_v39, %v1054_v33  ;;  %v781_v33 = vsub.f32 %v205_v26, %v493_v27  ;;  %v1068_v39 = vmul.f32 %v780_v28, %v780_v28  ;;  %v218_v27 = vld [vmem:[#allocation3 + $0x508] sm:$0xff] }
 0x135   :  { %v506_v28 = vld [vmem:[#allocation6 + $0x508] sm:$0xff] }
 0x136   :  { %v1343_v49 = vadd.f32 %v1342_v44, %v1055_v38  ;;  %v782_v38 = vsub.f32 %v206_v31, %v494_v32  ;;  %v1069_v44 = vmul.f32 %v781_v33, %v781_v33  ;;  %v219_v32 = vld [vmem:[#allocation3 + $0x510] sm:$0xff] }
 0x137   :  { %v507_v33 = vld [vmem:[#allocation6 + $0x510] sm:$0xff] }
 0x138   :  { %v1344_v54 = vadd.f32 %v1343_v49, %v1056_v43  ;;  %v783_v43 = vsub.f32 %v207_v36, %v495_v37  ;;  %v1070_v49 = vmul.f32 %v782_v38, %v782_v38  ;;  %v220_v37 = vld [vmem:[#allocation3 + $0x518] sm:$0xff] }
 0x139   :  { %v508_v38 = vld [vmem:[#allocation6 + $0x518] sm:$0xff] }
 0x13a   :  { %v1345_v59 = vadd.f32 %v1344_v54, %v1057_v48  ;;  %v784_v48 = vsub.f32 %v208_v41, %v496_v42  ;;  %v1071_v54 = vmul.f32 %v783_v43, %v783_v43  ;;  %v221_v42 = vld [vmem:[#allocation3 + $0x520] sm:$0xff] }
 0x13b   :  { %v509_v43 = vld [vmem:[#allocation6 + $0x520] sm:$0xff] }
 0x13c   :  { %v1346_v0 = vadd.f32 %v1345_v59, %v1058_v53  ;;  %v785_v53 = vsub.f32 %v209_v46, %v497_v47  ;;  %v1072_v59 = vmul.f32 %v784_v48, %v784_v48  ;;  %v222_v47 = vld [vmem:[#allocation3 + $0x528] sm:$0xff] }
 0x13d   :  { %v510_v48 = vld [vmem:[#allocation6 + $0x528] sm:$0xff] }
 0x13e   :  { %v1347_v5 = vadd.f32 %v1346_v0, %v1059_v58  ;;  %v786_v58 = vsub.f32 %v210_v51, %v498_v52  ;;  %v1073_v0 = vmul.f32 %v785_v53, %v785_v53  ;;  %v223_v52 = vld [vmem:[#allocation3 + $0x530] sm:$0xff] }
 0x13f   :  { %v511_v53 = vld [vmem:[#allocation6 + $0x530] sm:$0xff] }
 0x140   :  { %v1348_v10 = vadd.f32 %v1347_v5, %v1060_v63  ;;  %v787_v63 = vsub.f32 %v211_v56, %v499_v57  ;;  %v1074_v5 = vmul.f32 %v786_v58, %v786_v58  ;;  %v224_v57 = vld [vmem:[#allocation3 + $0x538] sm:$0xff] }
 0x141   :  { %v512_v58 = vld [vmem:[#allocation6 + $0x538] sm:$0xff] }
 0x142   :  { %v1349_v15 = vadd.f32 %v1348_v10, %v1061_v4  ;;  %v788_v4 = vsub.f32 %v212_v61, %v500_v62  ;;  %v1075_v10 = vmul.f32 %v787_v63, %v787_v63  ;;  %v225_v62 = vld [vmem:[#allocation3 + $0x540] sm:$0xff] }
 0x143   :  { %v513_v63 = vld [vmem:[#allocation6 + $0x540] sm:$0xff] }
 0x144   :  { %v1350_v20 = vadd.f32 %v1349_v15, %v1062_v9  ;;  %v789_v9 = vsub.f32 %v213_v2, %v501_v3  ;;  %v1076_v15 = vmul.f32 %v788_v4, %v788_v4  ;;  %v226_v3 = vld [vmem:[#allocation3 + $0x548] sm:$0xff] }
 0x145   :  { %v514_v4 = vld [vmem:[#allocation6 + $0x548] sm:$0xff] }
 0x146   :  { %v1351_v25 = vadd.f32 %v1350_v20, %v1063_v14  ;;  %v790_v14 = vsub.f32 %v214_v7, %v502_v8  ;;  %v1077_v20 = vmul.f32 %v789_v9, %v789_v9  ;;  %v227_v8 = vld [vmem:[#allocation3 + $0x550] sm:$0xff] }
 0x147   :  { %v515_v9 = vld [vmem:[#allocation6 + $0x550] sm:$0xff] }
 0x148   :  { %v1352_v30 = vadd.f32 %v1351_v25, %v1064_v19  ;;  %v791_v19 = vsub.f32 %v215_v12, %v503_v13  ;;  %v1078_v25 = vmul.f32 %v790_v14, %v790_v14  ;;  %v228_v13 = vld [vmem:[#allocation3 + $0x558] sm:$0xff] }
 0x149   :  { %v516_v14 = vld [vmem:[#allocation6 + $0x558] sm:$0xff] }
 0x14a   :  { %v1353_v35 = vadd.f32 %v1352_v30, %v1065_v24  ;;  %v792_v24 = vsub.f32 %v216_v17, %v504_v18  ;;  %v1079_v30 = vmul.f32 %v791_v19, %v791_v19  ;;  %v229_v18 = vld [vmem:[#allocation3 + $0x560] sm:$0xff] }
 0x14b   :  { %v517_v19 = vld [vmem:[#allocation6 + $0x560] sm:$0xff] }
 0x14c   :  { %v1354_v40 = vadd.f32 %v1353_v35, %v1066_v29  ;;  %v793_v29 = vsub.f32 %v217_v22, %v505_v23  ;;  %v1080_v35 = vmul.f32 %v792_v24, %v792_v24  ;;  %v230_v23 = vld [vmem:[#allocation3 + $0x568] sm:$0xff] }
 0x14d   :  { %v518_v24 = vld [vmem:[#allocation6 + $0x568] sm:$0xff] }
 0x14e   :  { %v1355_v45 = vadd.f32 %v1354_v40, %v1067_v34  ;;  %v794_v34 = vsub.f32 %v218_v27, %v506_v28  ;;  %v1081_v40 = vmul.f32 %v793_v29, %v793_v29  ;;  %v231_v28 = vld [vmem:[#allocation3 + $0x570] sm:$0xff] }
 0x14f   :  { %v519_v29 = vld [vmem:[#allocation6 + $0x570] sm:$0xff] }
 0x150   :  { %v1356_v50 = vadd.f32 %v1355_v45, %v1068_v39  ;;  %v795_v39 = vsub.f32 %v219_v32, %v507_v33  ;;  %v1082_v45 = vmul.f32 %v794_v34, %v794_v34  ;;  %v232_v33 = vld [vmem:[#allocation3 + $0x578] sm:$0xff] }
 0x151   :  { %v520_v34 = vld [vmem:[#allocation6 + $0x578] sm:$0xff] }
 0x152   :  { %v1357_v55 = vadd.f32 %v1356_v50, %v1069_v44  ;;  %v796_v44 = vsub.f32 %v220_v37, %v508_v38  ;;  %v1083_v50 = vmul.f32 %v795_v39, %v795_v39  ;;  %v233_v38 = vld [vmem:[#allocation3 + $0x580] sm:$0xff] }
 0x153   :  { %v521_v39 = vld [vmem:[#allocation6 + $0x580] sm:$0xff] }
 0x154   :  { %v1358_v60 = vadd.f32 %v1357_v55, %v1070_v49  ;;  %v797_v49 = vsub.f32 %v221_v42, %v509_v43  ;;  %v1084_v55 = vmul.f32 %v796_v44, %v796_v44  ;;  %v234_v43 = vld [vmem:[#allocation3 + $0x588] sm:$0xff] }
 0x155   :  { %v522_v44 = vld [vmem:[#allocation6 + $0x588] sm:$0xff] }
 0x156   :  { %v1359_v1 = vadd.f32 %v1358_v60, %v1071_v54  ;;  %v798_v54 = vsub.f32 %v222_v47, %v510_v48  ;;  %v1085_v60 = vmul.f32 %v797_v49, %v797_v49  ;;  %v235_v48 = vld [vmem:[#allocation3 + $0x590] sm:$0xff] }
 0x157   :  { %v523_v49 = vld [vmem:[#allocation6 + $0x590] sm:$0xff] }
 0x158   :  { %v1360_v6 = vadd.f32 %v1359_v1, %v1072_v59  ;;  %v799_v59 = vsub.f32 %v223_v52, %v511_v53  ;;  %v1086_v1 = vmul.f32 %v798_v54, %v798_v54  ;;  %v236_v53 = vld [vmem:[#allocation3 + $0x598] sm:$0xff] }
 0x159   :  { %v524_v54 = vld [vmem:[#allocation6 + $0x598] sm:$0xff] }
 0x15a   :  { %v1361_v11 = vadd.f32 %v1360_v6, %v1073_v0  ;;  %v800_v0 = vsub.f32 %v224_v57, %v512_v58  ;;  %v1087_v6 = vmul.f32 %v799_v59, %v799_v59  ;;  %v237_v58 = vld [vmem:[#allocation3 + $0x5a0] sm:$0xff] }
 0x15b   :  { %v525_v59 = vld [vmem:[#allocation6 + $0x5a0] sm:$0xff] }
 0x15c   :  { %v1362_v16 = vadd.f32 %v1361_v11, %v1074_v5  ;;  %v801_v5 = vsub.f32 %v225_v62, %v513_v63  ;;  %v1088_v11 = vmul.f32 %v800_v0, %v800_v0  ;;  %v238_v63 = vld [vmem:[#allocation3 + $0x5a8] sm:$0xff] }
 0x15d   :  { %v526_v0 = vld [vmem:[#allocation6 + $0x5a8] sm:$0xff] }
 0x15e   :  { %v1363_v21 = vadd.f32 %v1362_v16, %v1075_v10  ;;  %v802_v10 = vsub.f32 %v226_v3, %v514_v4  ;;  %v1089_v16 = vmul.f32 %v801_v5, %v801_v5  ;;  %v239_v4 = vld [vmem:[#allocation3 + $0x5b0] sm:$0xff] }
 0x15f   :  { %v527_v5 = vld [vmem:[#allocation6 + $0x5b0] sm:$0xff] }
 0x160   :  { %v1364_v26 = vadd.f32 %v1363_v21, %v1076_v15  ;;  %v803_v15 = vsub.f32 %v227_v8, %v515_v9  ;;  %v1090_v21 = vmul.f32 %v802_v10, %v802_v10  ;;  %v240_v9 = vld [vmem:[#allocation3 + $0x5b8] sm:$0xff] }
 0x161   :  { %v528_v10 = vld [vmem:[#allocation6 + $0x5b8] sm:$0xff] }
 0x162   :  { %v1365_v31 = vadd.f32 %v1364_v26, %v1077_v20  ;;  %v804_v20 = vsub.f32 %v228_v13, %v516_v14  ;;  %v1091_v26 = vmul.f32 %v803_v15, %v803_v15  ;;  %v241_v14 = vld [vmem:[#allocation3 + $0x5c0] sm:$0xff] }
 0x163   :  { %v529_v15 = vld [vmem:[#allocation6 + $0x5c0] sm:$0xff] }
 0x164   :  { %v1366_v36 = vadd.f32 %v1365_v31, %v1078_v25  ;;  %v805_v25 = vsub.f32 %v229_v18, %v517_v19  ;;  %v1092_v31 = vmul.f32 %v804_v20, %v804_v20  ;;  %v242_v19 = vld [vmem:[#allocation3 + $0x5c8] sm:$0xff] }
 0x165   :  { %v530_v20 = vld [vmem:[#allocation6 + $0x5c8] sm:$0xff] }
 0x166   :  { %v1367_v41 = vadd.f32 %v1366_v36, %v1079_v30  ;;  %v806_v30 = vsub.f32 %v230_v23, %v518_v24  ;;  %v1093_v36 = vmul.f32 %v805_v25, %v805_v25  ;;  %v243_v24 = vld [vmem:[#allocation3 + $0x5d0] sm:$0xff] }
 0x167   :  { %v531_v25 = vld [vmem:[#allocation6 + $0x5d0] sm:$0xff] }
 0x168   :  { %v1368_v46 = vadd.f32 %v1367_v41, %v1080_v35  ;;  %v807_v35 = vsub.f32 %v231_v28, %v519_v29  ;;  %v1094_v41 = vmul.f32 %v806_v30, %v806_v30  ;;  %v244_v29 = vld [vmem:[#allocation3 + $0x5d8] sm:$0xff] }
 0x169   :  { %v532_v30 = vld [vmem:[#allocation6 + $0x5d8] sm:$0xff] }
 0x16a   :  { %v1369_v51 = vadd.f32 %v1368_v46, %v1081_v40  ;;  %v808_v40 = vsub.f32 %v232_v33, %v520_v34  ;;  %v1095_v46 = vmul.f32 %v807_v35, %v807_v35  ;;  %v245_v34 = vld [vmem:[#allocation3 + $0x5e0] sm:$0xff] }
 0x16b   :  { %v533_v35 = vld [vmem:[#allocation6 + $0x5e0] sm:$0xff] }
 0x16c   :  { %v1370_v56 = vadd.f32 %v1369_v51, %v1082_v45  ;;  %v809_v45 = vsub.f32 %v233_v38, %v521_v39  ;;  %v1096_v51 = vmul.f32 %v808_v40, %v808_v40  ;;  %v246_v39 = vld [vmem:[#allocation3 + $0x5e8] sm:$0xff] }
 0x16d   :  { %v534_v40 = vld [vmem:[#allocation6 + $0x5e8] sm:$0xff] }
 0x16e   :  { %v1371_v61 = vadd.f32 %v1370_v56, %v1083_v50  ;;  %v810_v50 = vsub.f32 %v234_v43, %v522_v44  ;;  %v1097_v56 = vmul.f32 %v809_v45, %v809_v45  ;;  %v247_v44 = vld [vmem:[#allocation3 + $0x5f0] sm:$0xff] }
 0x16f   :  { %v535_v45 = vld [vmem:[#allocation6 + $0x5f0] sm:$0xff] }
 0x170   :  { %v1372_v2 = vadd.f32 %v1371_v61, %v1084_v55  ;;  %v811_v55 = vsub.f32 %v235_v48, %v523_v49  ;;  %v1098_v61 = vmul.f32 %v810_v50, %v810_v50  ;;  %v248_v49 = vld [vmem:[#allocation3 + $0x5f8] sm:$0xff] }
 0x171   :  { %v536_v50 = vld [vmem:[#allocation6 + $0x5f8] sm:$0xff] }
 0x172   :  { %v1373_v7 = vadd.f32 %v1372_v2, %v1085_v60  ;;  %v812_v60 = vsub.f32 %v236_v53, %v524_v54  ;;  %v1099_v2 = vmul.f32 %v811_v55, %v811_v55  ;;  %v249_v54 = vld [vmem:[#allocation3 + $0x600] sm:$0xff] }
 0x173   :  { %v537_v55 = vld [vmem:[#allocation6 + $0x600] sm:$0xff] }
 0x174   :  { %v1374_v12 = vadd.f32 %v1373_v7, %v1086_v1  ;;  %v813_v1 = vsub.f32 %v237_v58, %v525_v59  ;;  %v1100_v7 = vmul.f32 %v812_v60, %v812_v60  ;;  %v250_v59 = vld [vmem:[#allocation3 + $0x608] sm:$0xff] }
 0x175   :  { %v538_v60 = vld [vmem:[#allocation6 + $0x608] sm:$0xff] }
 0x176   :  { %v1375_v17 = vadd.f32 %v1374_v12, %v1087_v6  ;;  %v814_v6 = vsub.f32 %v238_v63, %v526_v0  ;;  %v1101_v12 = vmul.f32 %v813_v1, %v813_v1  ;;  %v251_v0 = vld [vmem:[#allocation3 + $0x610] sm:$0xff] }
 0x177   :  { %v539_v1 = vld [vmem:[#allocation6 + $0x610] sm:$0xff] }
 0x178   :  { %v1376_v22 = vadd.f32 %v1375_v17, %v1088_v11  ;;  %v815_v11 = vsub.f32 %v239_v4, %v527_v5  ;;  %v1102_v17 = vmul.f32 %v814_v6, %v814_v6  ;;  %v252_v5 = vld [vmem:[#allocation3 + $0x618] sm:$0xff] }
 0x179   :  { %v540_v6 = vld [vmem:[#allocation6 + $0x618] sm:$0xff] }
 0x17a   :  { %v1377_v27 = vadd.f32 %v1376_v22, %v1089_v16  ;;  %v816_v16 = vsub.f32 %v240_v9, %v528_v10  ;;  %v1103_v22 = vmul.f32 %v815_v11, %v815_v11  ;;  %v253_v10 = vld [vmem:[#allocation3 + $0x620] sm:$0xff] }
 0x17b   :  { %v541_v11 = vld [vmem:[#allocation6 + $0x620] sm:$0xff] }
 0x17c   :  { %v1378_v32 = vadd.f32 %v1377_v27, %v1090_v21  ;;  %v817_v21 = vsub.f32 %v241_v14, %v529_v15  ;;  %v1104_v27 = vmul.f32 %v816_v16, %v816_v16  ;;  %v254_v15 = vld [vmem:[#allocation3 + $0x628] sm:$0xff] }
 0x17d   :  { %v542_v16 = vld [vmem:[#allocation6 + $0x628] sm:$0xff] }
 0x17e   :  { %v1379_v37 = vadd.f32 %v1378_v32, %v1091_v26  ;;  %v818_v26 = vsub.f32 %v242_v19, %v530_v20  ;;  %v1105_v32 = vmul.f32 %v817_v21, %v817_v21  ;;  %v255_v20 = vld [vmem:[#allocation3 + $0x630] sm:$0xff] }
 0x17f   :  { %v543_v21 = vld [vmem:[#allocation6 + $0x630] sm:$0xff] }
 0x180   :  { %v1380_v42 = vadd.f32 %v1379_v37, %v1092_v31  ;;  %v819_v31 = vsub.f32 %v243_v24, %v531_v25  ;;  %v1106_v37 = vmul.f32 %v818_v26, %v818_v26  ;;  %v256_v25 = vld [vmem:[#allocation3 + $0x638] sm:$0xff] }
 0x181   :  { %v544_v26 = vld [vmem:[#allocation6 + $0x638] sm:$0xff] }
 0x182   :  { %v1381_v47 = vadd.f32 %v1380_v42, %v1093_v36  ;;  %v820_v36 = vsub.f32 %v244_v29, %v532_v30  ;;  %v1107_v42 = vmul.f32 %v819_v31, %v819_v31  ;;  %v257_v30 = vld [vmem:[#allocation3 + $0x640] sm:$0xff] }
 0x183   :  { %v545_v31 = vld [vmem:[#allocation6 + $0x640] sm:$0xff] }
 0x184   :  { %v1382_v52 = vadd.f32 %v1381_v47, %v1094_v41  ;;  %v821_v41 = vsub.f32 %v245_v34, %v533_v35  ;;  %v1108_v47 = vmul.f32 %v820_v36, %v820_v36  ;;  %v258_v35 = vld [vmem:[#allocation3 + $0x648] sm:$0xff] }
 0x185   :  { %v546_v36 = vld [vmem:[#allocation6 + $0x648] sm:$0xff] }
 0x186   :  { %v1383_v57 = vadd.f32 %v1382_v52, %v1095_v46  ;;  %v822_v46 = vsub.f32 %v246_v39, %v534_v40  ;;  %v1109_v52 = vmul.f32 %v821_v41, %v821_v41  ;;  %v259_v40 = vld [vmem:[#allocation3 + $0x650] sm:$0xff] }
 0x187   :  { %v547_v41 = vld [vmem:[#allocation6 + $0x650] sm:$0xff] }
 0x188   :  { %v1384_v62 = vadd.f32 %v1383_v57, %v1096_v51  ;;  %v823_v51 = vsub.f32 %v247_v44, %v535_v45  ;;  %v1110_v57 = vmul.f32 %v822_v46, %v822_v46  ;;  %v260_v45 = vld [vmem:[#allocation3 + $0x658] sm:$0xff] }
 0x189   :  { %v548_v46 = vld [vmem:[#allocation6 + $0x658] sm:$0xff] }
 0x18a   :  { %v1385_v3 = vadd.f32 %v1384_v62, %v1097_v56  ;;  %v824_v56 = vsub.f32 %v248_v49, %v536_v50  ;;  %v1111_v62 = vmul.f32 %v823_v51, %v823_v51  ;;  %v261_v50 = vld [vmem:[#allocation3 + $0x660] sm:$0xff] }
 0x18b   :  { %v549_v51 = vld [vmem:[#allocation6 + $0x660] sm:$0xff] }
 0x18c   :  { %v1386_v8 = vadd.f32 %v1385_v3, %v1098_v61  ;;  %v825_v61 = vsub.f32 %v249_v54, %v537_v55  ;;  %v1112_v3 = vmul.f32 %v824_v56, %v824_v56  ;;  %v262_v55 = vld [vmem:[#allocation3 + $0x668] sm:$0xff] }
 0x18d   :  { %v550_v56 = vld [vmem:[#allocation6 + $0x668] sm:$0xff] }
 0x18e   :  { %v1387_v13 = vadd.f32 %v1386_v8, %v1099_v2  ;;  %v826_v2 = vsub.f32 %v250_v59, %v538_v60  ;;  %v1113_v8 = vmul.f32 %v825_v61, %v825_v61  ;;  %v263_v60 = vld [vmem:[#allocation3 + $0x670] sm:$0xff] }
 0x18f   :  { %v551_v61 = vld [vmem:[#allocation6 + $0x670] sm:$0xff] }
 0x190   :  { %v1388_v18 = vadd.f32 %v1387_v13, %v1100_v7  ;;  %v827_v7 = vsub.f32 %v251_v0, %v539_v1  ;;  %v1114_v13 = vmul.f32 %v826_v2, %v826_v2  ;;  %v264_v1 = vld [vmem:[#allocation3 + $0x678] sm:$0xff] }
 0x191   :  { %v552_v2 = vld [vmem:[#allocation6 + $0x678] sm:$0xff] }
 0x192   :  { %v1389_v23 = vadd.f32 %v1388_v18, %v1101_v12  ;;  %v828_v12 = vsub.f32 %v252_v5, %v540_v6  ;;  %v1115_v18 = vmul.f32 %v827_v7, %v827_v7  ;;  %v265_v6 = vld [vmem:[#allocation3 + $0x680] sm:$0xff] }
 0x193   :  { %v553_v7 = vld [vmem:[#allocation6 + $0x680] sm:$0xff] }
 0x194   :  { %v1390_v28 = vadd.f32 %v1389_v23, %v1102_v17  ;;  %v829_v17 = vsub.f32 %v253_v10, %v541_v11  ;;  %v1116_v23 = vmul.f32 %v828_v12, %v828_v12  ;;  %v266_v11 = vld [vmem:[#allocation3 + $0x688] sm:$0xff] }
 0x195   :  { %v554_v12 = vld [vmem:[#allocation6 + $0x688] sm:$0xff] }
 0x196   :  { %v1391_v33 = vadd.f32 %v1390_v28, %v1103_v22  ;;  %v830_v22 = vsub.f32 %v254_v15, %v542_v16  ;;  %v1117_v28 = vmul.f32 %v829_v17, %v829_v17  ;;  %v267_v16 = vld [vmem:[#allocation3 + $0x690] sm:$0xff] }
 0x197   :  { %v555_v17 = vld [vmem:[#allocation6 + $0x690] sm:$0xff] }
 0x198   :  { %v1392_v38 = vadd.f32 %v1391_v33, %v1104_v27  ;;  %v831_v27 = vsub.f32 %v255_v20, %v543_v21  ;;  %v1118_v33 = vmul.f32 %v830_v22, %v830_v22  ;;  %v268_v21 = vld [vmem:[#allocation3 + $0x698] sm:$0xff] }
 0x199   :  { %v556_v22 = vld [vmem:[#allocation6 + $0x698] sm:$0xff] }
 0x19a   :  { %v1393_v43 = vadd.f32 %v1392_v38, %v1105_v32  ;;  %v832_v32 = vsub.f32 %v256_v25, %v544_v26  ;;  %v1119_v38 = vmul.f32 %v831_v27, %v831_v27  ;;  %v269_v26 = vld [vmem:[#allocation3 + $0x6a0] sm:$0xff] }
 0x19b   :  { %v557_v27 = vld [vmem:[#allocation6 + $0x6a0] sm:$0xff] }
 0x19c   :  { %v1394_v48 = vadd.f32 %v1393_v43, %v1106_v37  ;;  %v833_v37 = vsub.f32 %v257_v30, %v545_v31  ;;  %v1120_v43 = vmul.f32 %v832_v32, %v832_v32  ;;  %v270_v31 = vld [vmem:[#allocation3 + $0x6a8] sm:$0xff] }
 0x19d   :  { %v558_v32 = vld [vmem:[#allocation6 + $0x6a8] sm:$0xff] }
 0x19e   :  { %v1395_v53 = vadd.f32 %v1394_v48, %v1107_v42  ;;  %v834_v42 = vsub.f32 %v258_v35, %v546_v36  ;;  %v1121_v48 = vmul.f32 %v833_v37, %v833_v37  ;;  %v271_v36 = vld [vmem:[#allocation3 + $0x6b0] sm:$0xff] }
 0x19f   :  { %v559_v37 = vld [vmem:[#allocation6 + $0x6b0] sm:$0xff] }
 0x1a0   :  { %v1396_v58 = vadd.f32 %v1395_v53, %v1108_v47  ;;  %v835_v47 = vsub.f32 %v259_v40, %v547_v41  ;;  %v1122_v53 = vmul.f32 %v834_v42, %v834_v42  ;;  %v272_v41 = vld [vmem:[#allocation3 + $0x6b8] sm:$0xff] }
 0x1a1   :  { %v560_v42 = vld [vmem:[#allocation6 + $0x6b8] sm:$0xff] }
 0x1a2   :  { %v1397_v63 = vadd.f32 %v1396_v58, %v1109_v52  ;;  %v836_v52 = vsub.f32 %v260_v45, %v548_v46  ;;  %v1123_v58 = vmul.f32 %v835_v47, %v835_v47  ;;  %v273_v46 = vld [vmem:[#allocation3 + $0x6c0] sm:$0xff] }
 0x1a3   :  { %v561_v47 = vld [vmem:[#allocation6 + $0x6c0] sm:$0xff] }
 0x1a4   :  { %v1398_v4 = vadd.f32 %v1397_v63, %v1110_v57  ;;  %v837_v57 = vsub.f32 %v261_v50, %v549_v51  ;;  %v1124_v63 = vmul.f32 %v836_v52, %v836_v52  ;;  %v274_v51 = vld [vmem:[#allocation3 + $0x6c8] sm:$0xff] }
 0x1a5   :  { %v562_v52 = vld [vmem:[#allocation6 + $0x6c8] sm:$0xff] }
 0x1a6   :  { %v1399_v9 = vadd.f32 %v1398_v4, %v1111_v62  ;;  %v838_v62 = vsub.f32 %v262_v55, %v550_v56  ;;  %v1125_v4 = vmul.f32 %v837_v57, %v837_v57  ;;  %v275_v56 = vld [vmem:[#allocation3 + $0x6d0] sm:$0xff] }
 0x1a7   :  { %v563_v57 = vld [vmem:[#allocation6 + $0x6d0] sm:$0xff] }
 0x1a8   :  { %v1400_v14 = vadd.f32 %v1399_v9, %v1112_v3  ;;  %v839_v3 = vsub.f32 %v263_v60, %v551_v61  ;;  %v1126_v9 = vmul.f32 %v838_v62, %v838_v62  ;;  %v276_v61 = vld [vmem:[#allocation3 + $0x6d8] sm:$0xff] }
 0x1a9   :  { %v564_v62 = vld [vmem:[#allocation6 + $0x6d8] sm:$0xff] }
 0x1aa   :  { %v1401_v19 = vadd.f32 %v1400_v14, %v1113_v8  ;;  %v840_v8 = vsub.f32 %v264_v1, %v552_v2  ;;  %v1127_v14 = vmul.f32 %v839_v3, %v839_v3  ;;  %v277_v2 = vld [vmem:[#allocation3 + $0x6e0] sm:$0xff] }
 0x1ab   :  { %v565_v3 = vld [vmem:[#allocation6 + $0x6e0] sm:$0xff] }
 0x1ac   :  { %v1402_v24 = vadd.f32 %v1401_v19, %v1114_v13  ;;  %v841_v13 = vsub.f32 %v265_v6, %v553_v7  ;;  %v1128_v19 = vmul.f32 %v840_v8, %v840_v8  ;;  %v278_v7 = vld [vmem:[#allocation3 + $0x6e8] sm:$0xff] }
 0x1ad   :  { %v566_v8 = vld [vmem:[#allocation6 + $0x6e8] sm:$0xff] }
 0x1ae   :  { %v1403_v29 = vadd.f32 %v1402_v24, %v1115_v18  ;;  %v842_v18 = vsub.f32 %v266_v11, %v554_v12  ;;  %v1129_v24 = vmul.f32 %v841_v13, %v841_v13  ;;  %v279_v12 = vld [vmem:[#allocation3 + $0x6f0] sm:$0xff] }
 0x1af   :  { %v567_v13 = vld [vmem:[#allocation6 + $0x6f0] sm:$0xff] }
 0x1b0   :  { %v1404_v34 = vadd.f32 %v1403_v29, %v1116_v23  ;;  %v843_v23 = vsub.f32 %v267_v16, %v555_v17  ;;  %v1130_v29 = vmul.f32 %v842_v18, %v842_v18  ;;  %v280_v17 = vld [vmem:[#allocation3 + $0x6f8] sm:$0xff] }
 0x1b1   :  { %v568_v18 = vld [vmem:[#allocation6 + $0x6f8] sm:$0xff] }
 0x1b2   :  { %v1405_v39 = vadd.f32 %v1404_v34, %v1117_v28  ;;  %v844_v28 = vsub.f32 %v268_v21, %v556_v22  ;;  %v1131_v34 = vmul.f32 %v843_v23, %v843_v23  ;;  %v281_v22 = vld [vmem:[#allocation3 + $0x700] sm:$0xff] }
 0x1b3   :  { %v569_v23 = vld [vmem:[#allocation6 + $0x700] sm:$0xff] }
 0x1b4   :  { %v1406_v44 = vadd.f32 %v1405_v39, %v1118_v33  ;;  %v845_v33 = vsub.f32 %v269_v26, %v557_v27  ;;  %v1132_v39 = vmul.f32 %v844_v28, %v844_v28  ;;  %v282_v27 = vld [vmem:[#allocation3 + $0x708] sm:$0xff] }
 0x1b5   :  { %v570_v28 = vld [vmem:[#allocation6 + $0x708] sm:$0xff] }
 0x1b6   :  { %v1407_v49 = vadd.f32 %v1406_v44, %v1119_v38  ;;  %v846_v38 = vsub.f32 %v270_v31, %v558_v32  ;;  %v1133_v44 = vmul.f32 %v845_v33, %v845_v33  ;;  %v283_v32 = vld [vmem:[#allocation3 + $0x710] sm:$0xff] }
 0x1b7   :  { %v571_v33 = vld [vmem:[#allocation6 + $0x710] sm:$0xff] }
 0x1b8   :  { %v1408_v54 = vadd.f32 %v1407_v49, %v1120_v43  ;;  %v847_v43 = vsub.f32 %v271_v36, %v559_v37  ;;  %v1134_v49 = vmul.f32 %v846_v38, %v846_v38  ;;  %v284_v37 = vld [vmem:[#allocation3 + $0x718] sm:$0xff] }
 0x1b9   :  { %v572_v38 = vld [vmem:[#allocation6 + $0x718] sm:$0xff] }
 0x1ba   :  { %v1409_v59 = vadd.f32 %v1408_v54, %v1121_v48  ;;  %v848_v48 = vsub.f32 %v272_v41, %v560_v42  ;;  %v1135_v54 = vmul.f32 %v847_v43, %v847_v43  ;;  %v285_v42 = vld [vmem:[#allocation3 + $0x720] sm:$0xff] }
 0x1bb   :  { %v573_v43 = vld [vmem:[#allocation6 + $0x720] sm:$0xff] }
 0x1bc   :  { %v1410_v0 = vadd.f32 %v1409_v59, %v1122_v53  ;;  %v849_v53 = vsub.f32 %v273_v46, %v561_v47  ;;  %v1136_v59 = vmul.f32 %v848_v48, %v848_v48  ;;  %v286_v47 = vld [vmem:[#allocation3 + $0x728] sm:$0xff] }
 0x1bd   :  { %v574_v48 = vld [vmem:[#allocation6 + $0x728] sm:$0xff] }
 0x1be   :  { %v1411_v5 = vadd.f32 %v1410_v0, %v1123_v58  ;;  %v850_v58 = vsub.f32 %v274_v51, %v562_v52  ;;  %v1137_v0 = vmul.f32 %v849_v53, %v849_v53  ;;  %v287_v52 = vld [vmem:[#allocation3 + $0x730] sm:$0xff] }
 0x1bf   :  { %v575_v53 = vld [vmem:[#allocation6 + $0x730] sm:$0xff] }
 0x1c0   :  { %v1412_v10 = vadd.f32 %v1411_v5, %v1124_v63  ;;  %v851_v63 = vsub.f32 %v275_v56, %v563_v57  ;;  %v1138_v5 = vmul.f32 %v850_v58, %v850_v58  ;;  %v288_v57 = vld [vmem:[#allocation3 + $0x738] sm:$0xff] }
 0x1c1   :  { %v576_v58 = vld [vmem:[#allocation6 + $0x738] sm:$0xff] }
 0x1c2   :  { %v1413_v15 = vadd.f32 %v1412_v10, %v1125_v4  ;;  %v852_v4 = vsub.f32 %v276_v61, %v564_v62  ;;  %v1139_v10 = vmul.f32 %v851_v63, %v851_v63  ;;  %v289_v62 = vld [vmem:[#allocation3 + $0x740] sm:$0xff] }
 0x1c3   :  { %v577_v63 = vld [vmem:[#allocation6 + $0x740] sm:$0xff] }
 0x1c4   :  { %v1414_v20 = vadd.f32 %v1413_v15, %v1126_v9  ;;  %v853_v9 = vsub.f32 %v277_v2, %v565_v3  ;;  %v1140_v15 = vmul.f32 %v852_v4, %v852_v4  ;;  %v290_v3 = vld [vmem:[#allocation3 + $0x748] sm:$0xff] }
 0x1c5   :  { %v578_v4 = vld [vmem:[#allocation6 + $0x748] sm:$0xff] }
 0x1c6   :  { %v1415_v25 = vadd.f32 %v1414_v20, %v1127_v14  ;;  %v854_v14 = vsub.f32 %v278_v7, %v566_v8  ;;  %v1141_v20 = vmul.f32 %v853_v9, %v853_v9  ;;  %v291_v8 = vld [vmem:[#allocation3 + $0x750] sm:$0xff] }
 0x1c7   :  { %v579_v9 = vld [vmem:[#allocation6 + $0x750] sm:$0xff] }
 0x1c8   :  { %v1416_v30 = vadd.f32 %v1415_v25, %v1128_v19  ;;  %v855_v19 = vsub.f32 %v279_v12, %v567_v13  ;;  %v1142_v25 = vmul.f32 %v854_v14, %v854_v14  ;;  %v292_v13 = vld [vmem:[#allocation3 + $0x758] sm:$0xff] }
 0x1c9   :  { %v580_v14 = vld [vmem:[#allocation6 + $0x758] sm:$0xff] }
 0x1ca   :  { %v1417_v35 = vadd.f32 %v1416_v30, %v1129_v24  ;;  %v856_v24 = vsub.f32 %v280_v17, %v568_v18  ;;  %v1143_v30 = vmul.f32 %v855_v19, %v855_v19  ;;  %v293_v18 = vld [vmem:[#allocation3 + $0x760] sm:$0xff] }
 0x1cb   :  { %v581_v19 = vld [vmem:[#allocation6 + $0x760] sm:$0xff] }
 0x1cc   :  { %v1418_v40 = vadd.f32 %v1417_v35, %v1130_v29  ;;  %v857_v29 = vsub.f32 %v281_v22, %v569_v23  ;;  %v1144_v35 = vmul.f32 %v856_v24, %v856_v24  ;;  %v294_v23 = vld [vmem:[#allocation3 + $0x768] sm:$0xff] }
 0x1cd   :  { %v582_v24 = vld [vmem:[#allocation6 + $0x768] sm:$0xff] }
 0x1ce   :  { %v1419_v45 = vadd.f32 %v1418_v40, %v1131_v34  ;;  %v858_v34 = vsub.f32 %v282_v27, %v570_v28  ;;  %v1145_v40 = vmul.f32 %v857_v29, %v857_v29  ;;  %v295_v28 = vld [vmem:[#allocation3 + $0x770] sm:$0xff] }
 0x1cf   :  { %v583_v29 = vld [vmem:[#allocation6 + $0x770] sm:$0xff] }
 0x1d0   :  { %v1420_v50 = vadd.f32 %v1419_v45, %v1132_v39  ;;  %v859_v39 = vsub.f32 %v283_v32, %v571_v33  ;;  %v1146_v45 = vmul.f32 %v858_v34, %v858_v34  ;;  %v296_v33 = vld [vmem:[#allocation3 + $0x778] sm:$0xff] }
 0x1d1   :  { %v584_v34 = vld [vmem:[#allocation6 + $0x778] sm:$0xff] }
 0x1d2   :  { %v1421_v55 = vadd.f32 %v1420_v50, %v1133_v44  ;;  %v860_v44 = vsub.f32 %v284_v37, %v572_v38  ;;  %v1147_v50 = vmul.f32 %v859_v39, %v859_v39  ;;  %v297_v38 = vld [vmem:[#allocation3 + $0x780] sm:$0xff] }
 0x1d3   :  { %v585_v39 = vld [vmem:[#allocation6 + $0x780] sm:$0xff] }
 0x1d4   :  { %v1422_v60 = vadd.f32 %v1421_v55, %v1134_v49  ;;  %v861_v49 = vsub.f32 %v285_v42, %v573_v43  ;;  %v1148_v55 = vmul.f32 %v860_v44, %v860_v44  ;;  %v298_v43 = vld [vmem:[#allocation3 + $0x788] sm:$0xff] }
 0x1d5   :  { %v586_v44 = vld [vmem:[#allocation6 + $0x788] sm:$0xff] }
 0x1d6   :  { %v1423_v1 = vadd.f32 %v1422_v60, %v1135_v54  ;;  %v862_v54 = vsub.f32 %v286_v47, %v574_v48  ;;  %v1149_v60 = vmul.f32 %v861_v49, %v861_v49  ;;  %v299_v48 = vld [vmem:[#allocation3 + $0x790] sm:$0xff] }
 0x1d7   :  { %v587_v49 = vld [vmem:[#allocation6 + $0x790] sm:$0xff] }
 0x1d8   :  { %v1424_v6 = vadd.f32 %v1423_v1, %v1136_v59  ;;  %v863_v59 = vsub.f32 %v287_v52, %v575_v53  ;;  %v1150_v1 = vmul.f32 %v862_v54, %v862_v54  ;;  %v300_v53 = vld [vmem:[#allocation3 + $0x798] sm:$0xff] }
 0x1d9   :  { %v588_v54 = vld [vmem:[#allocation6 + $0x798] sm:$0xff] }
 0x1da   :  { %v1425_v11 = vadd.f32 %v1424_v6, %v1137_v0  ;;  %v864_v0 = vsub.f32 %v288_v57, %v576_v58  ;;  %v1151_v6 = vmul.f32 %v863_v59, %v863_v59  ;;  %v301_v58 = vld [vmem:[#allocation3 + $0x7a0] sm:$0xff] }
 0x1db   :  { %v589_v59 = vld [vmem:[#allocation6 + $0x7a0] sm:$0xff] }
 0x1dc   :  { %v1426_v16 = vadd.f32 %v1425_v11, %v1138_v5  ;;  %v865_v5 = vsub.f32 %v289_v62, %v577_v63  ;;  %v1152_v11 = vmul.f32 %v864_v0, %v864_v0  ;;  %v302_v63 = vld [vmem:[#allocation3 + $0x7a8] sm:$0xff] }
 0x1dd   :  { %v590_v0 = vld [vmem:[#allocation6 + $0x7a8] sm:$0xff] }
 0x1de   :  { %v1427_v21 = vadd.f32 %v1426_v16, %v1139_v10  ;;  %v866_v10 = vsub.f32 %v290_v3, %v578_v4  ;;  %v1153_v16 = vmul.f32 %v865_v5, %v865_v5  ;;  %v303_v4 = vld [vmem:[#allocation3 + $0x7b0] sm:$0xff] }
 0x1df   :  { %v591_v5 = vld [vmem:[#allocation6 + $0x7b0] sm:$0xff] }
 0x1e0   :  { %v1428_v26 = vadd.f32 %v1427_v21, %v1140_v15  ;;  %v867_v15 = vsub.f32 %v291_v8, %v579_v9  ;;  %v1154_v21 = vmul.f32 %v866_v10, %v866_v10  ;;  %v304_v9 = vld [vmem:[#allocation3 + $0x7b8] sm:$0xff] }
 0x1e1   :  { %v592_v10 = vld [vmem:[#allocation6 + $0x7b8] sm:$0xff] }
 0x1e2   :  { %v1429_v31 = vadd.f32 %v1428_v26, %v1141_v20  ;;  %v868_v20 = vsub.f32 %v292_v13, %v580_v14  ;;  %v1155_v26 = vmul.f32 %v867_v15, %v867_v15  ;;  %v305_v14 = vld [vmem:[#allocation3 + $0x7c0] sm:$0xff] }
 0x1e3   :  { %v593_v15 = vld [vmem:[#allocation6 + $0x7c0] sm:$0xff] }
 0x1e4   :  { %v1430_v36 = vadd.f32 %v1429_v31, %v1142_v25  ;;  %v869_v25 = vsub.f32 %v293_v18, %v581_v19  ;;  %v1156_v31 = vmul.f32 %v868_v20, %v868_v20  ;;  %v306_v19 = vld [vmem:[#allocation3 + $0x7c8] sm:$0xff] }
 0x1e5   :  { %v594_v20 = vld [vmem:[#allocation6 + $0x7c8] sm:$0xff] }
 0x1e6   :  { %v1431_v41 = vadd.f32 %v1430_v36, %v1143_v30  ;;  %v870_v30 = vsub.f32 %v294_v23, %v582_v24  ;;  %v1157_v36 = vmul.f32 %v869_v25, %v869_v25  ;;  %v307_v24 = vld [vmem:[#allocation3 + $0x7d0] sm:$0xff] }
 0x1e7   :  { %v595_v25 = vld [vmem:[#allocation6 + $0x7d0] sm:$0xff] }
 0x1e8   :  { %v1432_v46 = vadd.f32 %v1431_v41, %v1144_v35  ;;  %v871_v35 = vsub.f32 %v295_v28, %v583_v29  ;;  %v1158_v41 = vmul.f32 %v870_v30, %v870_v30  ;;  %v308_v29 = vld [vmem:[#allocation3 + $0x7d8] sm:$0xff] }
 0x1e9   :  { %v596_v30 = vld [vmem:[#allocation6 + $0x7d8] sm:$0xff] }
 0x1ea   :  { %v1433_v51 = vadd.f32 %v1432_v46, %v1145_v40  ;;  %v872_v40 = vsub.f32 %v296_v33, %v584_v34  ;;  %v1159_v46 = vmul.f32 %v871_v35, %v871_v35  ;;  %v309_v34 = vld [vmem:[#allocation3 + $0x7e0] sm:$0xff] }
 0x1eb   :  { %v597_v35 = vld [vmem:[#allocation6 + $0x7e0] sm:$0xff] }
 0x1ec   :  { %v1434_v56 = vadd.f32 %v1433_v51, %v1146_v45  ;;  %v873_v45 = vsub.f32 %v297_v38, %v585_v39  ;;  %v1160_v51 = vmul.f32 %v872_v40, %v872_v40  ;;  %v310_v39 = vld [vmem:[#allocation3 + $0x7e8] sm:$0xff] }
 0x1ed   :  { %v598_v40 = vld [vmem:[#allocation6 + $0x7e8] sm:$0xff] }
 0x1ee   :  { %v1435_v61 = vadd.f32 %v1434_v56, %v1147_v50  ;;  %v874_v50 = vsub.f32 %v298_v43, %v586_v44  ;;  %v1161_v56 = vmul.f32 %v873_v45, %v873_v45  ;;  %v311_v44 = vld [vmem:[#allocation3 + $0x7f0] sm:$0xff] }
 0x1ef   :  { %v599_v45 = vld [vmem:[#allocation6 + $0x7f0] sm:$0xff] }
 0x1f0   :  { %v1436_v2 = vadd.f32 %v1435_v61, %v1148_v55  ;;  %v875_v55 = vsub.f32 %v299_v48, %v587_v49  ;;  %v1162_v61 = vmul.f32 %v874_v50, %v874_v50  ;;  %v312_v49 = vld [vmem:[#allocation3 + $0x7f8] sm:$0xff] }
 0x1f1   :  { %v600_v50 = vld [vmem:[#allocation6 + $0x7f8] sm:$0xff] }
 0x1f2   :  { %v1437_v7 = vadd.f32 %v1436_v2, %v1149_v60  ;;  %v876_v60 = vsub.f32 %v300_v53, %v588_v54  ;;  %v1163_v2 = vmul.f32 %v875_v55, %v875_v55  ;;  %v313_v54 = vld [vmem:[#allocation3 + $0x800] sm:$0xff] }
 0x1f3   :  { %v601_v55 = vld [vmem:[#allocation6 + $0x800] sm:$0xff] }
 0x1f4   :  { %v1438_v12 = vadd.f32 %v1437_v7, %v1150_v1  ;;  %v877_v1 = vsub.f32 %v301_v58, %v589_v59  ;;  %v1164_v7 = vmul.f32 %v876_v60, %v876_v60  ;;  %v314_v59 = vld [vmem:[#allocation3 + $0x808] sm:$0xff] }
 0x1f5   :  { %v602_v60 = vld [vmem:[#allocation6 + $0x808] sm:$0xff] }
 0x1f6   :  { %v1439_v17 = vadd.f32 %v1438_v12, %v1151_v6  ;;  %v878_v6 = vsub.f32 %v302_v63, %v590_v0  ;;  %v1165_v12 = vmul.f32 %v877_v1, %v877_v1  ;;  %v315_v0 = vld [vmem:[#allocation3 + $0x810] sm:$0xff] }
 0x1f7   :  { %v603_v1 = vld [vmem:[#allocation6 + $0x810] sm:$0xff] }
 0x1f8   :  { %v1440_v22 = vadd.f32 %v1439_v17, %v1152_v11  ;;  %v879_v11 = vsub.f32 %v303_v4, %v591_v5  ;;  %v1166_v17 = vmul.f32 %v878_v6, %v878_v6  ;;  %v316_v5 = vld [vmem:[#allocation3 + $0x818] sm:$0xff] }
 0x1f9   :  { %v604_v6 = vld [vmem:[#allocation6 + $0x818] sm:$0xff] }
 0x1fa   :  { %v1441_v27 = vadd.f32 %v1440_v22, %v1153_v16  ;;  %v880_v16 = vsub.f32 %v304_v9, %v592_v10  ;;  %v1167_v22 = vmul.f32 %v879_v11, %v879_v11  ;;  %v317_v10 = vld [vmem:[#allocation3 + $0x820] sm:$0xff] }
 0x1fb   :  { %v605_v11 = vld [vmem:[#allocation6 + $0x820] sm:$0xff] }
 0x1fc   :  { %v1442_v32 = vadd.f32 %v1441_v27, %v1154_v21  ;;  %v881_v21 = vsub.f32 %v305_v14, %v593_v15  ;;  %v1168_v27 = vmul.f32 %v880_v16, %v880_v16  ;;  %v318_v15 = vld [vmem:[#allocation3 + $0x828] sm:$0xff] }
 0x1fd   :  { %v606_v16 = vld [vmem:[#allocation6 + $0x828] sm:$0xff] }
 0x1fe   :  { %v1443_v37 = vadd.f32 %v1442_v32, %v1155_v26  ;;  %v882_v26 = vsub.f32 %v306_v19, %v594_v20  ;;  %v1169_v32 = vmul.f32 %v881_v21, %v881_v21  ;;  %v319_v20 = vld [vmem:[#allocation3 + $0x830] sm:$0xff] }
 0x1ff   :  { %v607_v21 = vld [vmem:[#allocation6 + $0x830] sm:$0xff] }
 0x200   :  { %v1444_v42 = vadd.f32 %v1443_v37, %v1156_v31  ;;  %v883_v31 = vsub.f32 %v307_v24, %v595_v25  ;;  %v1170_v37 = vmul.f32 %v882_v26, %v882_v26  ;;  %v320_v25 = vld [vmem:[#allocation3 + $0x838] sm:$0xff] }
 0x201   :  { %v608_v26 = vld [vmem:[#allocation6 + $0x838] sm:$0xff] }
 0x202   :  { %v1445_v47 = vadd.f32 %v1444_v42, %v1157_v36  ;;  %v884_v36 = vsub.f32 %v308_v29, %v596_v30  ;;  %v1171_v42 = vmul.f32 %v883_v31, %v883_v31  ;;  %v321_v30 = vld [vmem:[#allocation3 + $0x840] sm:$0xff] }
 0x203   :  { %v609_v31 = vld [vmem:[#allocation6 + $0x840] sm:$0xff] }
 0x204   :  { %v1446_v52 = vadd.f32 %v1445_v47, %v1158_v41  ;;  %v885_v41 = vsub.f32 %v309_v34, %v597_v35  ;;  %v1172_v47 = vmul.f32 %v884_v36, %v884_v36  ;;  %v322_v35 = vld [vmem:[#allocation3 + $0x848] sm:$0xff] }
 0x205   :  { %v610_v36 = vld [vmem:[#allocation6 + $0x848] sm:$0xff] }
 0x206   :  { %v1447_v57 = vadd.f32 %v1446_v52, %v1159_v46  ;;  %v886_v46 = vsub.f32 %v310_v39, %v598_v40  ;;  %v1173_v52 = vmul.f32 %v885_v41, %v885_v41  ;;  %v323_v40 = vld [vmem:[#allocation3 + $0x850] sm:$0xff] }
 0x207   :  { %v611_v41 = vld [vmem:[#allocation6 + $0x850] sm:$0xff] }
 0x208   :  { %v1448_v62 = vadd.f32 %v1447_v57, %v1160_v51  ;;  %v887_v51 = vsub.f32 %v311_v44, %v599_v45  ;;  %v1174_v57 = vmul.f32 %v886_v46, %v886_v46  ;;  %v324_v45 = vld [vmem:[#allocation3 + $0x858] sm:$0xff] }
 0x209   :  { %v612_v46 = vld [vmem:[#allocation6 + $0x858] sm:$0xff] }
 0x20a   :  { %v1449_v3 = vadd.f32 %v1448_v62, %v1161_v56  ;;  %v888_v56 = vsub.f32 %v312_v49, %v600_v50  ;;  %v1175_v62 = vmul.f32 %v887_v51, %v887_v51  ;;  %v325_v50 = vld [vmem:[#allocation3 + $0x860] sm:$0xff] }
 0x20b   :  { %v613_v51 = vld [vmem:[#allocation6 + $0x860] sm:$0xff] }
 0x20c   :  { %v1450_v8 = vadd.f32 %v1449_v3, %v1162_v61  ;;  %v889_v61 = vsub.f32 %v313_v54, %v601_v55  ;;  %v1176_v3 = vmul.f32 %v888_v56, %v888_v56  ;;  %v326_v55 = vld [vmem:[#allocation3 + $0x868] sm:$0xff] }
 0x20d   :  { %v614_v56 = vld [vmem:[#allocation6 + $0x868] sm:$0xff] }
 0x20e   :  { %v1451_v13 = vadd.f32 %v1450_v8, %v1163_v2  ;;  %v890_v2 = vsub.f32 %v314_v59, %v602_v60  ;;  %v1177_v8 = vmul.f32 %v889_v61, %v889_v61  ;;  %v327_v60 = vld [vmem:[#allocation3 + $0x870] sm:$0xff] }
 0x20f   :  { %v615_v61 = vld [vmem:[#allocation6 + $0x870] sm:$0xff] }
 0x210   :  { %v1452_v18 = vadd.f32 %v1451_v13, %v1164_v7  ;;  %v891_v7 = vsub.f32 %v315_v0, %v603_v1  ;;  %v1178_v13 = vmul.f32 %v890_v2, %v890_v2  ;;  %v328_v1 = vld [vmem:[#allocation3 + $0x878] sm:$0xff] }
 0x211   :  { %v616_v2 = vld [vmem:[#allocation6 + $0x878] sm:$0xff] }
 0x212   :  { %v1453_v23 = vadd.f32 %v1452_v18, %v1165_v12  ;;  %v892_v12 = vsub.f32 %v316_v5, %v604_v6  ;;  %v1179_v18 = vmul.f32 %v891_v7, %v891_v7  ;;  %v329_v6 = vld [vmem:[#allocation3 + $0x880] sm:$0xff] }
 0x213   :  { %v617_v7 = vld [vmem:[#allocation6 + $0x880] sm:$0xff] }
 0x214   :  { %v1454_v28 = vadd.f32 %v1453_v23, %v1166_v17  ;;  %v893_v17 = vsub.f32 %v317_v10, %v605_v11  ;;  %v1180_v23 = vmul.f32 %v892_v12, %v892_v12  ;;  %v330_v11 = vld [vmem:[#allocation3 + $0x888] sm:$0xff] }
 0x215   :  { %v618_v12 = vld [vmem:[#allocation6 + $0x888] sm:$0xff] }
 0x216   :  { %v1455_v33 = vadd.f32 %v1454_v28, %v1167_v22  ;;  %v894_v22 = vsub.f32 %v318_v15, %v606_v16  ;;  %v1181_v28 = vmul.f32 %v893_v17, %v893_v17  ;;  %v331_v16 = vld [vmem:[#allocation3 + $0x890] sm:$0xff] }
 0x217   :  { %v619_v17 = vld [vmem:[#allocation6 + $0x890] sm:$0xff] }
 0x218   :  { %v1456_v38 = vadd.f32 %v1455_v33, %v1168_v27  ;;  %v895_v27 = vsub.f32 %v319_v20, %v607_v21  ;;  %v1182_v33 = vmul.f32 %v894_v22, %v894_v22  ;;  %v332_v21 = vld [vmem:[#allocation3 + $0x898] sm:$0xff] }
 0x219   :  { %v620_v22 = vld [vmem:[#allocation6 + $0x898] sm:$0xff] }
 0x21a   :  { %v1457_v43 = vadd.f32 %v1456_v38, %v1169_v32  ;;  %v896_v32 = vsub.f32 %v320_v25, %v608_v26  ;;  %v1183_v38 = vmul.f32 %v895_v27, %v895_v27  ;;  %v333_v26 = vld [vmem:[#allocation3 + $0x8a0] sm:$0xff] }
 0x21b   :  { %v621_v27 = vld [vmem:[#allocation6 + $0x8a0] sm:$0xff] }
 0x21c   :  { %v1458_v48 = vadd.f32 %v1457_v43, %v1170_v37  ;;  %v897_v37 = vsub.f32 %v321_v30, %v609_v31  ;;  %v1184_v43 = vmul.f32 %v896_v32, %v896_v32  ;;  %v334_v31 = vld [vmem:[#allocation3 + $0x8a8] sm:$0xff] }
 0x21d   :  { %v622_v32 = vld [vmem:[#allocation6 + $0x8a8] sm:$0xff] }
 0x21e   :  { %v1459_v53 = vadd.f32 %v1458_v48, %v1171_v42  ;;  %v898_v42 = vsub.f32 %v322_v35, %v610_v36  ;;  %v1185_v48 = vmul.f32 %v897_v37, %v897_v37  ;;  %v335_v36 = vld [vmem:[#allocation3 + $0x8b0] sm:$0xff] }
 0x21f   :  { %v623_v37 = vld [vmem:[#allocation6 + $0x8b0] sm:$0xff] }
 0x220   :  { %v1460_v58 = vadd.f32 %v1459_v53, %v1172_v47  ;;  %v899_v47 = vsub.f32 %v323_v40, %v611_v41  ;;  %v1186_v53 = vmul.f32 %v898_v42, %v898_v42  ;;  %v336_v41 = vld [vmem:[#allocation3 + $0x8b8] sm:$0xff] }
 0x221   :  { %v624_v42 = vld [vmem:[#allocation6 + $0x8b8] sm:$0xff] }
 0x222   :  { %v1461_v63 = vadd.f32 %v1460_v58, %v1173_v52  ;;  %v900_v52 = vsub.f32 %v324_v45, %v612_v46  ;;  %v1187_v58 = vmul.f32 %v899_v47, %v899_v47  ;;  %v337_v46 = vld [vmem:[#allocation3 + $0x8c0] sm:$0xff] }
 0x223   :  { %v625_v47 = vld [vmem:[#allocation6 + $0x8c0] sm:$0xff] }
 0x224   :  { %v1462_v4 = vadd.f32 %v1461_v63, %v1174_v57  ;;  %v901_v57 = vsub.f32 %v325_v50, %v613_v51  ;;  %v1188_v63 = vmul.f32 %v900_v52, %v900_v52  ;;  %v338_v51 = vld [vmem:[#allocation3 + $0x8c8] sm:$0xff] }
 0x225   :  { %v626_v52 = vld [vmem:[#allocation6 + $0x8c8] sm:$0xff] }
 0x226   :  { %v1463_v9 = vadd.f32 %v1462_v4, %v1175_v62  ;;  %v902_v62 = vsub.f32 %v326_v55, %v614_v56  ;;  %v1189_v4 = vmul.f32 %v901_v57, %v901_v57  ;;  %v339_v56 = vld [vmem:[#allocation3 + $0x8d0] sm:$0xff] }
 0x227   :  { %v627_v57 = vld [vmem:[#allocation6 + $0x8d0] sm:$0xff] }
 0x228   :  { %v1464_v14 = vadd.f32 %v1463_v9, %v1176_v3  ;;  %v903_v3 = vsub.f32 %v327_v60, %v615_v61  ;;  %v1190_v9 = vmul.f32 %v902_v62, %v902_v62  ;;  %v340_v61 = vld [vmem:[#allocation3 + $0x8d8] sm:$0xff] }
 0x229   :  { %v628_v62 = vld [vmem:[#allocation6 + $0x8d8] sm:$0xff] }
 0x22a   :  { %v1465_v19 = vadd.f32 %v1464_v14, %v1177_v8  ;;  %v904_v8 = vsub.f32 %v328_v1, %v616_v2  ;;  %v1191_v14 = vmul.f32 %v903_v3, %v903_v3  ;;  %v341_v2 = vld [vmem:[#allocation3 + $0x8e0] sm:$0xff] }
 0x22b   :  { %v629_v3 = vld [vmem:[#allocation6 + $0x8e0] sm:$0xff] }
 0x22c   :  { %v1466_v24 = vadd.f32 %v1465_v19, %v1178_v13  ;;  %v905_v13 = vsub.f32 %v329_v6, %v617_v7  ;;  %v1192_v19 = vmul.f32 %v904_v8, %v904_v8  ;;  %v342_v7 = vld [vmem:[#allocation3 + $0x8e8] sm:$0xff] }
 0x22d   :  { %v630_v8 = vld [vmem:[#allocation6 + $0x8e8] sm:$0xff] }
 0x22e   :  { %v1467_v29 = vadd.f32 %v1466_v24, %v1179_v18  ;;  %v906_v18 = vsub.f32 %v330_v11, %v618_v12  ;;  %v1193_v24 = vmul.f32 %v905_v13, %v905_v13  ;;  %v343_v12 = vld [vmem:[#allocation3 + $0x8f0] sm:$0xff] }
 0x22f   :  { %v631_v13 = vld [vmem:[#allocation6 + $0x8f0] sm:$0xff] }
 0x230   :  { %v1468_v34 = vadd.f32 %v1467_v29, %v1180_v23  ;;  %v907_v23 = vsub.f32 %v331_v16, %v619_v17  ;;  %v1194_v29 = vmul.f32 %v906_v18, %v906_v18  ;;  %v344_v17 = vld [vmem:[#allocation3 + $0x8f8] sm:$0xff] }
 0x231   :  { %v632_v18 = vld [vmem:[#allocation6 + $0x8f8] sm:$0xff] }
 0x232   :  { %v1469_v39 = vadd.f32 %v1468_v34, %v1181_v28  ;;  %v908_v28 = vsub.f32 %v332_v21, %v620_v22  ;;  %v1195_v34 = vmul.f32 %v907_v23, %v907_v23  ;;  %v920_v22 = vsub.f32 %v344_v17, %v632_v18 }
 0x234   :  { %v1470_v44 = vadd.f32 %v1469_v39, %v1182_v33  ;;  %v909_v33 = vsub.f32 %v333_v26, %v621_v27  ;;  %v1196_v39 = vmul.f32 %v908_v28, %v908_v28  ;;  %v1208_v27 = vmul.f32 %v920_v22, %v920_v22 }
 0x236   :  { %v1471_v49 = vadd.f32 %v1470_v44, %v1183_v38  ;;  %v910_v38 = vsub.f32 %v334_v31, %v622_v32  ;;  %v1197_v44 = vmul.f32 %v909_v33, %v909_v33 }
 0x238   :  { %v1472_v54 = vadd.f32 %v1471_v49, %v1184_v43  ;;  %v911_v43 = vsub.f32 %v335_v36, %v623_v37  ;;  %v1198_v49 = vmul.f32 %v910_v38, %v910_v38 }
 0x23a   :  { %v1473_v59 = vadd.f32 %v1472_v54, %v1185_v48  ;;  %v912_v48 = vsub.f32 %v336_v41, %v624_v42  ;;  %v1199_v54 = vmul.f32 %v911_v43, %v911_v43 }
 0x23c   :  { %v1474_v0 = vadd.f32 %v1473_v59, %v1186_v53  ;;  %v913_v53 = vsub.f32 %v337_v46, %v625_v47  ;;  %v1200_v59 = vmul.f32 %v912_v48, %v912_v48 }
 0x23e   :  { %v1475_v5 = vadd.f32 %v1474_v0, %v1187_v58  ;;  %v914_v58 = vsub.f32 %v338_v51, %v626_v52  ;;  %v1201_v0 = vmul.f32 %v913_v53, %v913_v53 }
 0x240   :  { %v1476_v10 = vadd.f32 %v1475_v5, %v1188_v63  ;;  %v915_v63 = vsub.f32 %v339_v56, %v627_v57  ;;  %v1202_v5 = vmul.f32 %v914_v58, %v914_v58 }
 0x242   :  { %v1477_v15 = vadd.f32 %v1476_v10, %v1189_v4  ;;  %v916_v4 = vsub.f32 %v340_v61, %v628_v62  ;;  %v1203_v10 = vmul.f32 %v915_v63, %v915_v63 }
 0x244   :  { %v1478_v20 = vadd.f32 %v1477_v15, %v1190_v9  ;;  %v917_v9 = vsub.f32 %v341_v2, %v629_v3  ;;  %v1204_v15 = vmul.f32 %v916_v4, %v916_v4 }
 0x246   :  { %v1479_v25 = vadd.f32 %v1478_v20, %v1191_v14  ;;  %v918_v14 = vsub.f32 %v342_v7, %v630_v8  ;;  %v1205_v20 = vmul.f32 %v917_v9, %v917_v9 }
 0x248   :  { %v1480_v30 = vadd.f32 %v1479_v25, %v1192_v19  ;;  %v919_v19 = vsub.f32 %v343_v12, %v631_v13  ;;  %v1206_v23 = vmul.f32 %v918_v14, %v918_v14 }
 0x24a   :  { %v1481_v35 = vadd.f32 %v1480_v30, %v1193_v24  ;;  %v1207_v25 = vmul.f32 %v919_v19, %v919_v19 }
 0x24c   :  { %v1482_v40 = vadd.f32 %v1481_v35, %v1194_v29 }
 0x24e   :  { %v1483_v45 = vadd.f32 %v1482_v40, %v1195_v34 }
 0x250   :  { %v1484_v50 = vadd.f32 %v1483_v45, %v1196_v39 }
 0x252   :  { %v1485_v55 = vadd.f32 %v1484_v50, %v1197_v44 }
 0x254   :  { %v1486_v60 = vadd.f32 %v1485_v55, %v1198_v49 }
 0x256   :  { %v1487_v1 = vadd.f32 %v1486_v60, %v1199_v54 }
 0x258   :  { %v1488_v6 = vadd.f32 %v1487_v1, %v1200_v59 }
 0x25a   :  { %v1489_v11 = vadd.f32 %v1488_v6, %v1201_v0 }
 0x25c   :  { %v1490_v16 = vadd.f32 %v1489_v11, %v1202_v5 }
 0x25e   :  { %v1491_v21 = vadd.f32 %v1490_v16, %v1203_v10 }
 0x260   :  { %v1492_v24 = vadd.f32 %v1491_v21, %v1204_v15 }
 0x262   :  { %v1493_v26 = vadd.f32 %v1492_v24, %v1205_v20 }
 0x264   :  { %v1494_v28 = vadd.f32 %v1493_v26, %v1206_v23 }
 0x266   :  { %v1495_v29 = vadd.f32 %v1494_v28, %v1207_v25 }
 0x268   :  { %v1496_v30 = vadd.f32 %v1495_v29, %v1208_v27 }
 0x26a   :  { %1503 = vadd.xlane.f32.xlu0 %v1496_v30 }
 0x2f7   :  { %v1504_v31 = vpop.xlane.xlu0 %1503 }
 0x2f8   :  { %v1505_v32 = vrot.slane %v1504_v31, 4 }
 0x2fa   :  { %v1506_v33 = vadd.f32 %v1505_v32, %v1504_v31 }
 0x2fc   :  { %v1507_v34 = vrot.slane %v1506_v33, 2 }
 0x2fe   :  { %v1508_v35 = vadd.f32 %v1507_v34, %v1506_v33 }
 0x300   :  { %v1509_v36 = vrot.slane %v1508_v35, 1 }
 0x302   :  { %v1510_v37 = vadd.f32 %v1509_v36, %v1508_v35 }
 0x304   :  { %1529 = vpush %v1510_v37 }
 0x335   :  { %s1530_s1 = spop %1529 }
 0x336   :  { %1513 = sst [smem:[#allocation8]] %s1530_s1 }
 0x337   :  { %1589 = shalt.err (!%p1586_p4)
}
 0x338   :  { %s1600_s13 = smov [#allocation8]  }
 0x339   :  { %1521 = dma.smem_to_hbm %s1600_s13, 16, %s1654_s2, [#allocation5]  }
 0x33a   :  { %1594 = dma.done.wait [#allocation5], 16  }
 0x33b   :  { %1595 = vsyncadd [#allocation5], 4294967280 }
 0x33c   :  { %1525 = sfence }
 0x33d   :  { %1526 = vsyncpa [#allocation4], 1 }
 0x33e   :  { %1527 = vsyncpa [#allocation7], 1 }
 0x33f   :  { %1528 = vsyncpa [#allocation5], 1 }

</bundles_post_ra>
